<compile_context>
chip_gen: v5e
topology: v5e:2x2
jax: 0.10.0
libtpu: 0.0.40
codegen_flags: <defaults>
</compile_context>

<pallas_src>
import functools

import jax
import jax.numpy as jnp
from jax.experimental import pallas as pl
from jax.experimental.pallas import tpu as pltpu


def _dwconv_kernel(x_ref, w_ref, b_ref, col_ref, o_ref, *, H, W):
    """One (batch, channel-tile) block of the depthwise 3x3 conv.

    x_ref:   (1, Np, TC)  activations, Np = padded H*W, channels on lanes
    w_ref:   (3, 3, TC)   depthwise weights
    b_ref:   (1, TC)      bias
    col_ref: (Np, 1)      int32 column index (n % W) of each flattened position
    o_ref:   (1, Np, TC)  output
    """
    npad = x_ref.shape[1]
    n_valid = H * W

    x = x_ref[0].astype(jnp.float32)          # (Np, TC)
    w = w_ref[...].astype(jnp.float32)        # (3, 3, TC), loaded once
    b = b_ref[...].astype(jnp.float32)        # (1, TC)

    col = col_ref[...]                                        # (Np, 1) int32
    n = jax.lax.broadcasted_iota(jnp.int32, (npad, 1), 0)     # (Np, 1) int32

    # Multiplicative boundary masks, broadcast along lanes (like softmax 1/l).
    lmask = jnp.where(col > 0, 1.0, 0.0)            # has a left  neighbour (j-1)
    rmask = jnp.where(col < W - 1, 1.0, 0.0)        # has a right neighbour (j+1)
    tmask = jnp.where(n >= W, 1.0, 0.0)             # has an upper neighbour (i-1)
    bmask = jnp.where(n < n_valid - W, 1.0, 0.0)    # has a lower neighbour (i+1)

    def wt(kh, kw):                                 # (1, TC) weight tap
        return w[kh, kw][None, :]

    # Horizontal neighbours: sublane rotation of the flattened image on the XLU;
    # the wrapped boundary column is zeroed by the column masks.
    x_l = pltpu.roll(x, 1, 0) * lmask               # x[i, j-1, :]
    x_r = pltpu.roll(x, npad - 1, 0) * rmask        # x[i, j+1, :]

    # One horizontal 3-tap pass per kernel row; bias folded into the centre row.
    r_top = x_l * wt(0, 0) + x * wt(0, 1) + x_r * wt(0, 2)
    r_bot = x_l * wt(2, 0) + x * wt(2, 1) + x_r * wt(2, 2)
    acc = x_l * wt(1, 0) + x * wt(1, 1) + x_r * wt(1, 2) + b

    # Vertical neighbours: rotate whole row passes by +/- W flattened rows;
    # the wrapped boundary rows are zeroed by the row masks.
    acc = acc + pltpu.roll(r_top, W, 0) * tmask
    acc = acc + pltpu.roll(r_bot, npad - W, 0) * bmask

    o_ref[0] = acc.astype(o_ref.dtype)


@functools.partial(jax.jit, static_argnames=("H", "W"))
def dwconv_forward(x, weight, bias, H, W):
    """x: (B, N, C) with N == H*W; weight: (3, 3, C); bias: (C,). Returns (B, N, C)."""
    B, N, C = x.shape
    assert N == H * W, "sequence length must equal H*W"

    # Lane-dense channels (multiple of 128) and sublane-aligned sequence (multiple
    # of 8). Production dim=768 / typical H*W need no padding at all.
    c_pad = (-C) % 128
    n_pad = (-N) % 8
    if c_pad or n_pad:
        x = jnp.pad(x, ((0, 0), (0, n_pad), (0, c_pad)))
    if c_pad:
        weight = jnp.pad(weight, ((0, 0), (0, 0), (0, c_pad)))
        bias = jnp.pad(bias, ((0, c_pad),))
    Np, Cp = N + n_pad, C + c_pad

    # Channel tile: multiple of 128; 256 for dim=768 keeps per-step VMEM bounded.
    # TODO(synk): add an N (row-band) grid axis for very large H*W (>~8k positions).
    TC = 256 if Cp % 256 == 0 else 128

    bias2d = bias.reshape(1, Cp)
    col_idx = (jnp.arange(Np, dtype=jnp.int32) % W).reshape(Np, 1)

    out = pl.pallas_call(
        functools.partial(_dwconv_kernel, H=H, W=W),
        out_shape=jax.ShapeDtypeStruct((B, Np, Cp), x.dtype),
        grid_spec=pltpu.PrefetchScalarGridSpec(
            num_scalar_prefetch=0,
            grid=(B, Cp // TC),
            in_specs=[
                pl.BlockSpec((1, Np, TC), lambda b, c: (b, 0, c)),
                pl.BlockSpec((3, 3, TC), lambda b, c: (0, 0, c)),
                pl.BlockSpec((1, TC), lambda b, c: (0, c)),
                pl.BlockSpec((Np, 1), lambda b, c: (0, 0)),
            ],
            out_specs=pl.BlockSpec((1, Np, TC), lambda b, c: (b, 0, c)),
        ),
        compiler_params=pltpu.CompilerParams(
            dimension_semantics=("parallel", "parallel"),
            vmem_limit_bytes=48 * 1024 * 1024,
        ),
    )(x, weight, bias2d, col_idx)

    if c_pad or n_pad:
        out = out[:, :N, :C]
    return out


def _reference(x, weight, bias, H, W):
    """Pure-JAX reference using lax depthwise conv (NCHW, like PyTorch)."""
    B, N, C = x.shape
    x_nchw = jnp.transpose(x, (0, 2, 1)).reshape(B, C, H, W)
    # lax kernel layout OIHW with feature_group_count=C: (C, 1, 3, 3)
    k = jnp.transpose(weight, (2, 0, 1))[:, None, :, :]
    y = jax.lax.conv_general_dilated(
        x_nchw, k, window_strides=(1, 1), padding=((1, 1), (1, 1)),
        feature_group_count=C,
        dimension_numbers=("NCHW", "OIHW", "NCHW"),
    )
    y = y + bias[None, :, None, None]
    return jnp.transpose(y.reshape(B, C, N), (0, 2, 1))


if __name__ == "__main__":
    key = jax.random.PRNGKey(0)
    # Small stand-in for dim=768: C=384 exercises 3 channel tiles, B=2 batches.
    B, H, W, C = 2, 16, 16, 384
    N = H * W

    kx, kw, kb = jax.random.split(key, 3)
    x = jax.random.normal(kx, (B, N, C), dtype=jnp.float32)
    # nn.Conv2d(dim, dim, 3, groups=dim) weight (dim, 1, 3, 3) stored as (3, 3, dim)
    weight = jax.random.normal(kw, (3, 3, C), dtype=jnp.float32) * 0.1
    bias = jax.random.normal(kb, (C,), dtype=jnp.float32) * 0.1

    out = dwconv_forward(x, weight, bias, H, W)
    jax.block_until_ready(out)

    ref = _reference(x, weight, bias, H, W)
    assert out.shape == (B, N, C)
    assert jnp.allclose(out, ref, atol=1e-5, rtol=1e-5), float(
        jnp.max(jnp.abs(out - ref)))

    print("KERNEL_OK")
</pallas_src>

<mosaic_0001>
module attributes {stable_mosaic.version = 11 : i64} {
  func.func @_dwconv_kernel(%arg0: i32, %arg1: i32, %arg2: memref<1x256x128xf32, #tpu.memory_space<vmem>>, %arg3: memref<3x3x128xf32, #tpu.memory_space<vmem>>, %arg4: memref<1x128xf32, #tpu.memory_space<vmem>>, %arg5: memref<256x1xi32, #tpu.memory_space<vmem>>, %arg6: memref<1x256x128xf32, #tpu.memory_space<vmem>>) attributes {dimension_semantics = [#tpu.dimension_semantics<parallel>, #tpu.dimension_semantics<parallel>], iteration_bounds = array<i64: 2, 3>, scalar_prefetch = 0 : i64, scratch_operands = 0 : i64, tpu.core_type = #tpu.core_type<tc>, window_params = [{transform_indices = @transform_0, window_bounds = array<i64: 1, 256, 128>}, {transform_indices = @transform_1, window_bounds = array<i64: 3, 3, 128>}, {transform_indices = @transform_2, window_bounds = array<i64: 1, 128>}, {pipeline_mode = #tpu.pipeline_mode<synchronous>, transform_indices = @transform_3, window_bounds = array<i64: 256, 1>}, {transform_indices = @transform_4, window_bounds = array<i64: 1, 256, 128>}]} {
    %c0 = arith.constant 0 : index
    %c0_0 = arith.constant 0 : index
    %c0_1 = arith.constant 0 : index
    %0 = vector.load %arg2[%c0, %c0_0, %c0_1] : memref<1x256x128xf32, #tpu.memory_space<vmem>>, vector<1x256x128xf32>
    %1 = vector.shape_cast %0 : vector<1x256x128xf32> to vector<256x128xf32>
    %c0_2 = arith.constant 0 : index
    %c0_3 = arith.constant 0 : index
    %c0_4 = arith.constant 0 : index
    %2 = vector.load %arg3[%c0_2, %c0_3, %c0_4] : memref<3x3x128xf32, #tpu.memory_space<vmem>>, vector<3x3x128xf32>
    %c0_5 = arith.constant 0 : index
    %c0_6 = arith.constant 0 : index
    %3 = vector.load %arg4[%c0_5, %c0_6] : memref<1x128xf32, #tpu.memory_space<vmem>>, vector<1x128xf32>
    %c0_7 = arith.constant 0 : index
    %c0_8 = arith.constant 0 : index
    %4 = vector.load %arg5[%c0_7, %c0_8] : memref<256x1xi32, #tpu.memory_space<vmem>>, vector<256x1xi32>
    %5 = tpu.iota {dimensions = array<i32: 0>} : vector<256x1xi32>
    %c0_i32 = arith.constant 0 : i32
    %6 = vector.broadcast %c0_i32 : i32 to vector<256x1xi32>
    %7 = arith.cmpi sgt, %4, %6 : vector<256x1xi32>
    %cst = arith.constant 1.000000e+00 : f32
    %cst_9 = arith.constant 0.000000e+00 : f32
    %8 = vector.broadcast %cst : f32 to vector<256x1xf32>
    %9 = vector.broadcast %cst_9 : f32 to vector<256x1xf32>
    %10 = arith.select %7, %8, %9 : vector<256x1xi1>, vector<256x1xf32>
    %c15_i32 = arith.constant 15 : i32
    %11 = vector.broadcast %c15_i32 : i32 to vector<256x1xi32>
    %12 = arith.cmpi slt, %4, %11 : vector<256x1xi32>
    %cst_10 = arith.constant 1.000000e+00 : f32
    %cst_11 = arith.constant 0.000000e+00 : f32
    %13 = vector.broadcast %cst_10 : f32 to vector<256x1xf32>
    %14 = vector.broadcast %cst_11 : f32 to vector<256x1xf32>
    %15 = arith.select %12, %13, %14 : vector<256x1xi1>, vector<256x1xf32>
    %c16_i32 = arith.constant 16 : i32
    %16 = vector.broadcast %c16_i32 : i32 to vector<256x1xi32>
    %17 = arith.cmpi sge, %5, %16 : vector<256x1xi32>
    %cst_12 = arith.constant 1.000000e+00 : f32
    %cst_13 = arith.constant 0.000000e+00 : f32
    %18 = vector.broadcast %cst_12 : f32 to vector<256x1xf32>
    %19 = vector.broadcast %cst_13 : f32 to vector<256x1xf32>
    %20 = arith.select %17, %18, %19 : vector<256x1xi1>, vector<256x1xf32>
    %c240_i32 = arith.constant 240 : i32
    %21 = vector.broadcast %c240_i32 : i32 to vector<256x1xi32>
    %22 = arith.cmpi slt, %5, %21 : vector<256x1xi32>
    %cst_14 = arith.constant 1.000000e+00 : f32
    %cst_15 = arith.constant 0.000000e+00 : f32
    %23 = vector.broadcast %cst_14 : f32 to vector<256x1xf32>
    %24 = vector.broadcast %cst_15 : f32 to vector<256x1xf32>
    %25 = arith.select %22, %23, %24 : vector<256x1xi1>, vector<256x1xf32>
    %c1_i32 = arith.constant 1 : i32
    %26 = tpu.dynamic_rotate %1 by %c1_i32 dim 0 : vector<256x128xf32>, i32 -> vector<256x128xf32>
    %27 = vector.broadcast %10 : vector<256x1xf32> to vector<256x128xf32>
    %28 = arith.mulf %26, %27 : vector<256x128xf32>
    %c255_i32 = arith.constant 255 : i32
    %29 = tpu.dynamic_rotate %1 by %c255_i32 dim 0 : vector<256x128xf32>, i32 -> vector<256x128xf32>
    %30 = vector.broadcast %15 : vector<256x1xf32> to vector<256x128xf32>
    %31 = arith.mulf %29, %30 : vector<256x128xf32>
    %32 = vector.extract_strided_slice %2 {offsets = [0, 0, 0], sizes = [1, 1, 128], strides = [1, 1, 1]} : vector<3x3x128xf32> to vector<1x1x128xf32>
    %33 = vector.shape_cast %32 : vector<1x1x128xf32> to vector<128xf32>
    %34 = vector.shape_cast %33 : vector<128xf32> to vector<1x128xf32>
    %35 = vector.broadcast %34 : vector<1x128xf32> to vector<256x128xf32>
    %36 = arith.mulf %28, %35 : vector<256x128xf32>
    %37 = vector.extract_strided_slice %2 {offsets = [0, 1, 0], sizes = [1, 1, 128], strides = [1, 1, 1]} : vector<3x3x128xf32> to vector<1x1x128xf32>
    %38 = vector.shape_cast %37 : vector<1x1x128xf32> to vector<128xf32>
    %39 = vector.shape_cast %38 : vector<128xf32> to vector<1x128xf32>
    %40 = vector.broadcast %39 : vector<1x128xf32> to vector<256x128xf32>
    %41 = arith.mulf %1, %40 : vector<256x128xf32>
    %42 = arith.addf %36, %41 : vector<256x128xf32>
    %43 = vector.extract_strided_slice %2 {offsets = [0, 2, 0], sizes = [1, 1, 128], strides = [1, 1, 1]} : vector<3x3x128xf32> to vector<1x1x128xf32>
    %44 = vector.shape_cast %43 : vector<1x1x128xf32> to vector<128xf32>
    %45 = vector.shape_cast %44 : vector<128xf32> to vector<1x128xf32>
    %46 = vector.broadcast %45 : vector<1x128xf32> to vector<256x128xf32>
    %47 = arith.mulf %31, %46 : vector<256x128xf32>
    %48 = arith.addf %42, %47 : vector<256x128xf32>
    %49 = vector.extract_strided_slice %2 {offsets = [2, 0, 0], sizes = [1, 1, 128], strides = [1, 1, 1]} : vector<3x3x128xf32> to vector<1x1x128xf32>
    %50 = vector.shape_cast %49 : vector<1x1x128xf32> to vector<128xf32>
    %51 = vector.shape_cast %50 : vector<128xf32> to vector<1x128xf32>
    %52 = vector.broadcast %51 : vector<1x128xf32> to vector<256x128xf32>
    %53 = arith.mulf %28, %52 : vector<256x128xf32>
    %54 = vector.extract_strided_slice %2 {offsets = [2, 1, 0], sizes = [1, 1, 128], strides = [1, 1, 1]} : vector<3x3x128xf32> to vector<1x1x128xf32>
    %55 = vector.shape_cast %54 : vector<1x1x128xf32> to vector<128xf32>
    %56 = vector.shape_cast %55 : vector<128xf32> to vector<1x128xf32>
    %57 = vector.broadcast %56 : vector<1x128xf32> to vector<256x128xf32>
    %58 = arith.mulf %1, %57 : vector<256x128xf32>
    %59 = arith.addf %53, %58 : vector<256x128xf32>
    %60 = vector.extract_strided_slice %2 {offsets = [2, 2, 0], sizes = [1, 1, 128], strides = [1, 1, 1]} : vector<3x3x128xf32> to vector<1x1x128xf32>
    %61 = vector.shape_cast %60 : vector<1x1x128xf32> to vector<128xf32>
    %62 = vector.shape_cast %61 : vector<128xf32> to vector<1x128xf32>
    %63 = vector.broadcast %62 : vector<1x128xf32> to vector<256x128xf32>
    %64 = arith.mulf %31, %63 : vector<256x128xf32>
    %65 = arith.addf %59, %64 : vector<256x128xf32>
    %66 = vector.extract_strided_slice %2 {offsets = [1, 0, 0], sizes = [1, 1, 128], strides = [1, 1, 1]} : vector<3x3x128xf32> to vector<1x1x128xf32>
    %67 = vector.shape_cast %66 : vector<1x1x128xf32> to vector<128xf32>
    %68 = vector.shape_cast %67 : vector<128xf32> to vector<1x128xf32>
    %69 = vector.broadcast %68 : vector<1x128xf32> to vector<256x128xf32>
    %70 = arith.mulf %28, %69 : vector<256x128xf32>
    %71 = vector.extract_strided_slice %2 {offsets = [1, 1, 0], sizes = [1, 1, 128], strides = [1, 1, 1]} : vector<3x3x128xf32> to vector<1x1x128xf32>
    %72 = vector.shape_cast %71 : vector<1x1x128xf32> to vector<128xf32>
    %73 = vector.shape_cast %72 : vector<128xf32> to vector<1x128xf32>
    %74 = vector.broadcast %73 : vector<1x128xf32> to vector<256x128xf32>
    %75 = arith.mulf %1, %74 : vector<256x128xf32>
    %76 = arith.addf %70, %75 : vector<256x128xf32>
    %77 = vector.extract_strided_slice %2 {offsets = [1, 2, 0], sizes = [1, 1, 128], strides = [1, 1, 1]} : vector<3x3x128xf32> to vector<1x1x128xf32>
    %78 = vector.shape_cast %77 : vector<1x1x128xf32> to vector<128xf32>
    %79 = vector.shape_cast %78 : vector<128xf32> to vector<1x128xf32>
    %80 = vector.broadcast %79 : vector<1x128xf32> to vector<256x128xf32>
    %81 = arith.mulf %31, %80 : vector<256x128xf32>
    %82 = arith.addf %76, %81 : vector<256x128xf32>
    %83 = vector.broadcast %3 : vector<1x128xf32> to vector<256x128xf32>
    %84 = arith.addf %82, %83 : vector<256x128xf32>
    %c16_i32_16 = arith.constant 16 : i32
    %85 = tpu.dynamic_rotate %48 by %c16_i32_16 dim 0 : vector<256x128xf32>, i32 -> vector<256x128xf32>
    %86 = vector.broadcast %20 : vector<256x1xf32> to vector<256x128xf32>
    %87 = arith.mulf %85, %86 : vector<256x128xf32>
    %88 = arith.addf %84, %87 : vector<256x128xf32>
    %c240_i32_17 = arith.constant 240 : i32
    %89 = tpu.dynamic_rotate %65 by %c240_i32_17 dim 0 : vector<256x128xf32>, i32 -> vector<256x128xf32>
    %90 = vector.broadcast %25 : vector<256x1xf32> to vector<256x128xf32>
    %91 = arith.mulf %89, %90 : vector<256x128xf32>
    %92 = arith.addf %88, %91 : vector<256x128xf32>
    %c0_18 = arith.constant 0 : index
    %c0_19 = arith.constant 0 : index
    %c0_20 = arith.constant 0 : index
    %93 = vector.load %arg6[%c0_18, %c0_19, %c0_20] : memref<1x256x128xf32, #tpu.memory_space<vmem>>, vector<1x256x128xf32>
    %94 = vector.shape_cast %93 : vector<1x256x128xf32> to vector<256x128xf32>
    %95 = vector.shape_cast %92 : vector<256x128xf32> to vector<1x256x128xf32>
    tpu.vector_store %arg6[%c0_18, %c0_19, %c0_20], %95 {strides = array<i32>} : memref<1x256x128xf32, #tpu.memory_space<vmem>>, vector<1x256x128xf32>,
    return
  }
  func.func @transform_0(%arg0: i32, %arg1: i32) -> (i32, i32, i32) {
    %c0_i32 = arith.constant 0 : i32
    %c0_i32_0 = arith.constant 0 : i32
    return %arg0, %c0_i32, %arg1 : i32, i32, i32
  }
  func.func @transform_1(%arg0: i32, %arg1: i32) -> (i32, i32, i32) {
    %c0_i32 = arith.constant 0 : i32
    %c0_i32_0 = arith.constant 0 : i32
    %c0_i32_1 = arith.constant 0 : i32
    return %c0_i32, %c0_i32_0, %arg1 : i32, i32, i32
  }
  func.func @transform_2(%arg0: i32, %arg1: i32) -> (i32, i32) {
    %c0_i32 = arith.constant 0 : i32
    %c0_i32_0 = arith.constant 0 : i32
    return %c0_i32, %arg1 : i32, i32
  }
  func.func @transform_3(%arg0: i32, %arg1: i32) -> (i32, i32) {
    %c0_i32 = arith.constant 0 : i32
    %c0_i32_0 = arith.constant 0 : i32
    %c0_i32_1 = arith.constant 0 : i32
    return %c0_i32, %c0_i32_0 : i32, i32
  }
  func.func @transform_4(%arg0: i32, %arg1: i32) -> (i32, i32, i32) {
    %c0_i32 = arith.constant 0 : i32
    %c0_i32_0 = arith.constant 0 : i32
    return %arg0, %c0_i32, %arg1 : i32, i32, i32
  }
}

</mosaic_0001>

<bundles_post_ra>
// kernel: dwconv_forward.1
= control target key start
LH: loop header
LB: loop body
LE: loop exit
PB: predicated region body
PF: predicated region fallthrough
CT: control target
= control target key end

     0   :  { %s4502_s0 = inlined_call_operand.hbm [shape: f32[2,256,384], index: 0, kind: input, shape index: {}]   ;;  %s4503_s1 = inlined_call_operand.vmem [shape: f32[3,3,384], index: 1, kind: input, shape index: {}]   ;;  %s4504_s2 = inlined_call_operand.vmem [shape: f32[1,384], index: 2, kind: input, shape index: {}]   ;;  %s4505_s3 = inlined_call_operand.vmem [shape: s32[256,1], index: 3, kind: input, shape index: {}]   ;;  %s4506_s4 = inlined_call_operand.hbm [shape: f32[2,256,384], index: 4, kind: output, shape index: {}]  }
   0x1   :  { %4585 = sst [smem:[#allocation106_spill]] %s4506_s4 }
   0x2   :  { %9 = vsyncpa [#allocation3], 0 }
   0x3   :  { %11 = vsyncpa [#allocation3 + $0x1], 0 }
   0x4   :  { %12 = vsyncpa [#allocation4], 0 }
   0x5   :  { %14 = vsyncpa [#allocation4 + $0x1], 0  ;;  %s2471_s15 = smov 0   ;;  %s2473_s16 = smov 0  }
   0x6   :  { %s2475_s17 = smov 0   ;;  %s2477_s18 = smov 0  }
   0x7   :  { %s2479_s19 = smov 0   ;;  %s2481_s20 = smov 0  }
   0x8   :  { %s2483_s21 = smov 0   ;;  %s2485_s22 = smov 0  }
   0x9   :  { %s2487_s23 = smov 0   ;;  %s2489_s24 = smov 0  }
   0xa LB: > { %4586 = sst [smem:[#allocation9_spill]] %s2408_s17  ;;  %s2007_s25 = sadd.s32 4294967295, %s2436_s24   ;;  %s2436_s24 = sphi %s2489_s24, %s20_s24   ;;  %s2432_s23 = sphi %s2487_s23, %s4924_s23   ;;  %s2428_s22 = sphi %s2485_s22, %s4923_s22   ;;  %s2424_s21 = sphi %s2483_s21, %s4922_s21   ;;  %s2420_s20 = sphi %s2481_s20, %s4921_s20   ;;  %s2416_s19 = sphi %s2479_s19, %s4920_s19   ;;  %s2412_s18 = sphi %s2477_s18, %s4919_s18   ;;  %s2408_s17 = sphi %s2475_s17, %s4918_s17   ;;  %s2404_s16 = sphi %s2473_s16, %s4917_s16   ;;  %s2400_s15 = sphi %s2471_s15, %s4916_s15  }
   0xb   : > { %s2008_s26 = sadd.s32 4294967294, %s2436_s24   ;;  %s29_s27 = sadd.s32 1, %s2428_s22 }
   0xc   : > { %s32_s28 = sadd.s32 1, %s2432_s23  ;;  %p30_p0 = scmp.ge.s32.totalorder %s29_s27, 3 }
   0xd   : > { %s41_s29 = sadd.s32 1, %s2416_s19  ;;  %p48_p1 = scmp.ne.s32.totalorder %s2416_s19, %s2412_s18 }
   0xe   : > { %p49_p2 = scmp.eq.s32.totalorder %s2436_s24, 0  ;;  %s4926_s27 = smov (%p30_p0, %s29_s27), 0 }
   0xf   : > { %4587 = sst [smem:[#allocation10_spill]] %s4926_s27  ;;  %s4928_s28 = smov (!%p30_p0, %s32_s28), %s2432_s23 }
  0x10   : > { %s37_s30 = ssub.s32 %s2428_s22, %s4926_s27  ;;  %p2539_p3 = por %p49_p2, %p48_p1 }
  0x11   : > { %p34_p4 = scmp.ge.s32.totalorder %s4928_s28, 2  ;;  %p54_p5 = scmp.ne.s32.totalorder %s2412_s18, %s2408_s17 }
  0x12   : > { %p55_p6 = scmp.eq.s32.totalorder %s2007_s25, 0  ;;  %p65_p7 = scmp.eq.s32.totalorder %s37_s30, 0 }
  0x13   : > { %s4930_s28 = smov (%p34_p4, %s4928_s28), 0  ;;  %s67_s7 = sadd.s32 1, %s2404_s16 }
  0x14   : > { %4589 = sst [smem:[#allocation11_spill]] %s4930_s28  ;;  %p2550_p8 = por %p55_p6, %p54_p5 }
  0x15   : > { %s36_s8 = ssub.s32 %s2432_s23, %s4930_s28  ;;  %p74_p9 = scmp.ne.s32.totalorder %s2404_s16, %s2400_s15 }
  0x16   : > { %s38_s9 = sor.u32 %s37_s30, %s36_s8  ;;  %p153_p10 = scmp.eq.s32.totalorder %s2007_s25, 5 }
  0x17   : > { %p39_p11 = scmp.eq.s32.totalorder %s38_s9, 0  ;;  %p2561_p12 = por %p74_p9, %p49_p2 }
  0x18   : > { %s2566_s11 = scalar_select %p65_p7, %s2404_s16, %s67_s7  }
  0x19   : > { %s2569_s12 = scalar_select %p39_p11, %s2416_s19, %s41_s29  }
  0x1a   : > { %4592 = sst [smem:[#allocation12_spill]] %s2566_s11  ;;  %p2574_p13 = por %p153_p10, %p48_p1 }
  0x1b   : > { %4593 = sst [smem:[#allocation13_spill]] %s2569_s12  ;;  %p159_p0 = scmp.eq.s32.totalorder %s2008_s26, 5 }
  0x1c   : > { %s4594_s13 = scalar_select %p2574_p13, 1, 0 }
  0x1d   : > { %p2581_p4 = por %p159_p0, %p54_p5  ;;  %p2010_p2 = scmp.ge.s32.totalorder %s2436_s24, 6 }
  0x1e   : > { %4595 = sst [smem:[#allocation14_spill]] %s4594_s13  ;;  %s182_s25 = sand.u32 (!%p2010_p2), 1, %s2416_s19  }
  0x1f   : > { %s4596_s14 = scalar_select %p2581_p4, 1, 0 }
  0x20   : > { %178 = sbr.rel (%p2010_p2) target bundleno = 48 (0x30), region = 20  ;;  %s2011_s30 = sshll.u32 (!%p2010_p2), %s182_s25, 8 }
  0x21   : > { %4597 = sst [smem:[#allocation15_spill]] %s4596_s14  ;;  %s2021_s29 = smul.u32 (!%p2010_p2), 96, %s2432_s23 }
  0x22   : > { %s186_s9 = scalar_lea.vmem (!%p2010_p2), [#allocation2], %s2011_s30  ;;  %s183_s14 = scalar_lea.sflag (!%p2010_p2), [#allocation3], %s182_s25 }
  0x23   : > { %s190_s7 = sadd.s32 (!%p2010_p2), %s2428_s22, %s2021_s29  ;;  %s195_s28 = sshll.u32 (!%p2010_p2), %s186_s9, 4  ;;  %s196_s28 = int_to_ptr.vmem [resolvable:$true] %s195_s28 }
  0x24   : > { %s2012_s8 = sshll.u32 (!%p2010_p2), %s190_s7, 3  ;;  %s2438_s17 = smov (!%p2010_p2), 384  }
  0x25   : > { %s192_s12 = scalar_lea.hbm %s4502_s0, %s2012_s8  ;;  %s2439_s13 = smov 128  }
  0x26   : > { %s193_s11 = sshll.u32 %s192_s12, 4  ;;  %s2440_s4 = smov 8   ;;  %s194_s11 = int_to_ptr.hbm [resolvable:$true] %s193_s11 }
  0x27   : > { %2025 = dma.hbm_to_vmem [thread:$0]  (%p2539_p3), %s194_s11, 4096, %s196_s28, %s183_s14, %s2438_s17, %s2439_s13, %s2440_s4  }
  0x28   : > { %204 = sbr.rel (!%p2561_p12) target bundleno = 48 (0x30), region = 28  ;;  %s206_s29 = sand.u32 (%p2561_p12), 1, %s2404_s16  }
  0x29   : > { %s2013_s30 = sshll.u32 (%p2561_p12), %s2428_s22, 2  ;;  %s2022_s7 = smul.u32 (%p2561_p12), 12, %s206_s29 }
  0x2a   : > { %s210_s8 = scalar_lea.vmem (%p2561_p12), %s4503_s1, %s2013_s30 }
  0x2b   : > { %v227_v0 = vld [vmem:[%s210_s8] sm:$0xf] (%p2561_p12)  ;;  %v229_v1 = vld [vmem:[%s210_s8 + $0xc] sm:$0xf] (%p2561_p12)  ;;  %v231_v2 = vld [vmem:[%s210_s8 + $0x18] sm:$0xf] (%p2561_p12) }
  0x2c   : > { %s208_s12 = scalar_lea.vmem (%p2561_p12), [#allocation5], %s2022_s7 }
  0x2d   : > { %228 = vst [vmem:[%s208_s12] sm:$0xf] %v227_v0 }
  0x2e   : > { %230 = vst [vmem:[%s208_s12 + $0x4] sm:$0xf] %v229_v1 }
  0x2f   : > { %232 = vst [vmem:[%s208_s12 + $0x8] sm:$0xf] %v231_v2 }
  0x30 PF: > { %p2014_p1 = scmp.ge.s32.totalorder %s2436_s24, 1  ;;  %p267_p3 = scmp.lt.s32.totalorder %s2436_s24, 7 }
  0x32   : > { %p268_p5 = pnand %p2014_p1, %p267_p3 }
  0x34   : > { %271 = sbr.rel (%p268_p5) target bundleno = 373 (0x175), region = 73 }
  0x39   : > { %s2604_s4 = sand.u32 1, %s2412_s18  }
  0x3a   : > { %s2015_s17 = sshll.u32 %s2604_s4, 8  ;;  %s274_s28 = scalar_lea.sflag [#allocation3], %s2604_s4 }
  0x3b   : > { %s2610_s5 = scalar_lea.vmem [#allocation2], %s2015_s17 }
  0x3c   : > { %2391 = dma.done.wait (%p2550_p8), %s274_s28, 4096  }
  0x3d   : > { %2393 = vsyncadd (%p2550_p8), %s274_s28, 4294963200  ;;  %v2441_v3 = vmov 0   ;;  %v2619_v4 = vld [vmem:[%s4505_s3 + $0x40] sm:$0xff]  ;;  %v2624_v5 = vld [vmem:[%s4505_s3 + $0x48] sm:$0xff]  ;;  %v2442_v9 = vmov 0.0   ;;  %p317_p6 = scmp.lt.s32.totalorder %s2420_s20, 2 }
  0x3e   : > { %2144 = vset.pattern.permute.xlu2 %v2441_v3  ;;  %2133 = vset.pattern.permute.xlu1 %v2441_v3  ;;  %v2629_v6 = vld [vmem:[%s4505_s3 + $0x20] sm:$0xff]  ;;  %vm429_vm0 = vcmp.gt.s32.totalorder %v2619_v4, 0  ;;  %vm430_vm1 = vcmp.gt.s32.totalorder %v2624_v5, 0  ;;  %v2636_v7 = vld [vmem:[%s4505_s3 + $0x28] sm:$0xff]  ;;  %v2657_v16 = vld [vmem:[%s4505_s3 + $0x50] sm:$0xff]  ;;  %s284_s30 = sand.u32 1, %s2400_s15  }
  0x3f   : > { %2122 = vset.pattern.permute.xlu0 %v2441_v3  ;;  %v2641_v8 = vld [vmem:[%s4505_s3] sm:$0xff]  ;;  %v461_v10 = vsel %vm429_vm0, 1.0, %v2442_v9  ;;  %v462_v11 = vsel %vm430_vm1, 1.0, %v2442_v9  ;;  %vm425_vm2 = vcmp.gt.s32.totalorder %v2629_v6, 0  ;;  %vm426_vm3 = vcmp.gt.s32.totalorder %v2636_v7, 0  ;;  %v2650_v12 = vld [vmem:[%s4505_s3 + $0x8] sm:$0xff] }
  0x40   : > { %v2145_v13 = vpack.i.bf16 %v462_v11, %v461_v10  ;;  %v457_v14 = vsel %vm425_vm2, 1.0, %v2442_v9  ;;  %v458_v15 = vsel %vm426_vm3, 1.0, %v2442_v9  ;;  %v2662_v17 = vld [vmem:[%s4505_s3 + $0x58] sm:$0xff]  ;;  %v2667_v18 = vld [vmem:[%s4505_s3 + $0x30] sm:$0xff]  ;;  %vm421_vm4 = vcmp.gt.s32.totalorder %v2641_v8, 0  ;;  %v2701_v30 = vld [vmem:[%s4505_s3 + $0x80] sm:$0xff] }
  0x41   : > { %v2134_v19 = vpack.i.bf16 %v458_v15, %v457_v14  ;;  %vm422_vm5 = vcmp.gt.s32.totalorder %v2650_v12, 0  ;;  %v2674_v20 = vld [vmem:[%s4505_s3 + $0x38] sm:$0xff]  ;;  %v453_v21 = vsel %vm421_vm4, 1.0, %v2442_v9  ;;  %v2681_v23 = vld [vmem:[%s4505_s3 + $0x10] sm:$0xff]  ;;  %vm431_vm6 = vcmp.gt.s32.totalorder %v2657_v16, 0  ;;  %v2706_v31 = vld [vmem:[%s4505_s3 + $0x88] sm:$0xff] }
  0x42   : > { %2146 = vperm.xlu2 %2144, %v2145_v13   ;;  %v454_v22 = vsel %vm422_vm5, 1.0, %v2442_v9  ;;  %v2686_v24 = vld [vmem:[%s4505_s3 + $0x18] sm:$0xff]  ;;  %vm432_vm7 = vcmp.gt.s32.totalorder %v2662_v17, 0  ;;  %vm427_vm8 = vcmp.gt.s32.totalorder %v2667_v18, 0  ;;  %v463_v26 = vsel %vm431_vm6, 1.0, %v2442_v9  ;;  %v2713_v35 = vld [vmem:[%s4505_s3 + $0x70] sm:$0xff] }
  0x43   : > { %2135 = vperm.xlu1 %2133, %v2134_v19   ;;  %v2123_v25 = vpack.i.bf16 %v454_v22, %v453_v21  ;;  %v464_v27 = vsel %vm432_vm7, 1.0, %v2442_v9  ;;  %vm428_vm9 = vcmp.gt.s32.totalorder %v2674_v20, 0  ;;  %v459_v28 = vsel %vm427_vm8, 1.0, %v2442_v9  ;;  %v2718_v36 = vld [vmem:[%s4505_s3 + $0x78] sm:$0xff]  ;;  %v2725_v38 = vld [vmem:[%s4505_s3 + $0x60] sm:$0xff]  ;;  %v2730_v39 = vld [vmem:[%s4505_s3 + $0x68] sm:$0xff] }
  0x44   : > { %v460_v29 = vsel %vm428_vm9, 1.0, %v2442_v9  ;;  %vm423_vm10 = vcmp.gt.s32.totalorder %v2681_v23, 0  ;;  %vm424_vm11 = vcmp.gt.s32.totalorder %v2686_v24, 0  ;;  %v2150_v32 = vpack.i.bf16 %v464_v27, %v463_v26  ;;  %v2743_v45 = vld [vmem:[%s4505_s3 + $0xb0] sm:$0xff]  ;;  %v2748_v46 = vld [vmem:[%s4505_s3 + $0xb8] sm:$0xff]  ;;  %v2755_v50 = vld [vmem:[%s4505_s3 + $0xa0] sm:$0xff] }
  0x45   : > { %2124 = vperm.xlu0 %2122, %v2123_v25   ;;  %v455_v33 = vsel %vm423_vm10, 1.0, %v2442_v9  ;;  %v456_v34 = vsel %vm424_vm11, 1.0, %v2442_v9  ;;  %v2139_v37 = vpack.i.bf16 %v460_v29, %v459_v28  ;;  %vm437_vm12 = vcmp.gt.s32.totalorder %v2701_v30, 0  ;;  %v2760_v51 = vld [vmem:[%s4505_s3 + $0xa8] sm:$0xff]  ;;  %v2767_v53 = vld [vmem:[%s4505_s3 + $0x90] sm:$0xff]  ;;  %v2772_v54 = vld [vmem:[%s4505_s3 + $0x98] sm:$0xff] }
  0x46   : > { %vm438_vm13 = vcmp.gt.s32.totalorder %v2706_v31, 0  ;;  %v2128_v40 = vpack.i.bf16 %v456_v34, %v455_v33  ;;  %vm435_vm14 = vcmp.gt.s32.totalorder %v2713_v35, 0  ;;  %vm436_vm15 = vcmp.gt.s32.totalorder %v2718_v36, 0  ;;  %s318_s14 = scalar_select %p317_p6, %s2420_s20, 2  ;;  %v2787_v60 = vld [vmem:[%s4505_s3 + $0xe0] sm:$0xff]  ;;  %v2792_v61 = vld [vmem:[%s4505_s3 + $0xe8] sm:$0xff] }
  0x47   : > { %v469_v41 = vsel %vm437_vm12, 1.0, %v2442_v9  ;;  %v470_v42 = vsel %vm438_vm13, 1.0, %v2442_v9  ;;  %vm433_vm0 = vcmp.gt.s32.totalorder %v2725_v38, 0  ;;  %vm434_vm1 = vcmp.gt.s32.totalorder %v2730_v39, 0  ;;  %v2799_v1 = vld [vmem:[%s4505_s3 + $0xd0] sm:$0xff]  ;;  %v2804_v2 = vld [vmem:[%s4505_s3 + $0xd8] sm:$0xff] }
  0x48   : > { %v467_v43 = vsel %vm435_vm14, 1.0, %v2442_v9  ;;  %v468_v44 = vsel %vm436_vm15, 1.0, %v2442_v9  ;;  %v2165_v47 = vpack.i.bf16 %v470_v42, %v469_v41  ;;  %v465_v48 = vsel %vm433_vm0, 1.0, %v2442_v9  ;;  %s2809_s28 = scalar_lea.vmem %s4504_s2, %s318_s14  ;;  %v2816_v10 = vld [vmem:[%s4505_s3 + $0xc0] sm:$0xff]  ;;  %v2821_v11 = vld [vmem:[%s4505_s3 + $0xc8] sm:$0xff]  ;;  %v2838_v28 = vld [vmem:[%s4505_s3 + $0xf0] sm:$0xff] }
  0x49   : > { %v466_v49 = vsel %vm434_vm1, 1.0, %v2442_v9  ;;  %v2160_v52 = vpack.i.bf16 %v468_v44, %v467_v43  ;;  %vm443_vm2 = vcmp.gt.s32.totalorder %v2743_v45, 0  ;;  %vm444_vm3 = vcmp.gt.s32.totalorder %v2748_v46, 0  ;;  %v2843_v29 = vld [vmem:[%s4505_s3 + $0xf8] sm:$0xff]  ;;  %s2023_s7 = smul.u32 12, %s284_s30  ;;  %s4189_s9 = scalar_lea.vmem [#allocation6], %s2015_s17 }
  0x4a   : > { %2151 = vperm.xlu2 %2144, %v2150_v32   ;;  %v2155_v55 = vpack.i.bf16 %v466_v49, %v465_v48  ;;  %vm441_vm4 = vcmp.gt.s32.totalorder %v2755_v50, 0  ;;  %vm442_vm5 = vcmp.gt.s32.totalorder %v2760_v51, 0  ;;  %v475_v56 = vsel %vm443_vm2, 1.0, %v2442_v9  ;;  %s2024_s17 = smul.u32 96, %s2424_s21  ;;  %s4900_s8 = sld [smem:[#allocation106_spill]] }
  0x4b   : > { %2140 = vperm.xlu1 %2133, %v2139_v37   ;;  %v476_v57 = vsel %vm444_vm3, 1.0, %v2442_v9  ;;  %vm439_vm6 = vcmp.gt.s32.totalorder %v2767_v53, 0  ;;  %vm440_vm7 = vcmp.gt.s32.totalorder %v2772_v54, 0  ;;  %v473_v58 = vsel %vm441_vm4, 1.0, %v2442_v9  ;;  %s286_s15 = scalar_lea.vmem [#allocation5], %s2023_s7  ;;  %s1876_s13 = scalar_lea.sflag [#allocation4], %s2604_s4 }
  0x4c   : > { %v474_v59 = vsel %vm442_vm5, 1.0, %v2442_v9  ;;  %v2180_v62 = vpack.i.bf16 %v476_v57, %v475_v56  ;;  %v471_v63 = vsel %vm439_vm6, 1.0, %v2442_v9  ;;  %v472_v0 = vsel %vm440_vm7, 1.0, %v2442_v9  ;;  %s4411_s21 = sadd.s32 %s2420_s20, %s2024_s17 }
  0x4d   : > { %2129 = vperm.xlu0 %2122, %v2128_v40   ;;  %v2175_v3 = vpack.i.bf16 %v474_v59, %v473_v58  ;;  %vm449_vm8 = vcmp.gt.s32.totalorder %v2787_v60, 0  ;;  %vm450_vm9 = vcmp.gt.s32.totalorder %v2792_v61, 0  ;;  %v2170_v13 = vpack.i.bf16 %v472_v0, %v471_v63  ;;  %s2018_s20 = sshll.u32 %s4411_s21, 3 }
  0x4e   : > { %vm447_vm10 = vcmp.gt.s32.totalorder %v2799_v1, 0  ;;  %vm448_vm11 = vcmp.gt.s32.totalorder %v2804_v2, 0  ;;  %v481_v14 = vsel %vm449_vm8, 1.0, %v2442_v9  ;;  %v482_v15 = vsel %vm450_vm9, 1.0, %v2442_v9 }
  0x4f   : > { %vm445_vm12 = vcmp.gt.s32.totalorder %v2816_v10, 0  ;;  %vm446_vm13 = vcmp.gt.s32.totalorder %v2821_v11, 0  ;;  %v479_v19 = vsel %vm447_vm10, 1.0, %v2442_v9  ;;  %v480_v21 = vsel %vm448_vm11, 1.0, %v2442_v9 }
  0x50   : > { %v2195_v22 = vpack.i.bf16 %v482_v15, %v481_v14  ;;  %v477_v25 = vsel %vm445_vm12, 1.0, %v2442_v9  ;;  %v478_v26 = vsel %vm446_vm13, 1.0, %v2442_v9  ;;  %v2190_v27 = vpack.i.bf16 %v480_v21, %v479_v19  ;;  %s1888_s12 = scalar_lea.hbm %s4900_s8, %s2018_s20  ;;  %s2342_s29 = scalar_lea.hbm %s4900_s8, 1536 }
  0x51   : > { %vm487_vm14 = vcmp.lt.s32.totalorder %v2681_v23, 15  ;;  %vm488_vm15 = vcmp.lt.s32.totalorder %v2686_v24, 15  ;;  %vm485_vm0 = vcmp.lt.s32.totalorder %v2641_v8, 15  ;;  %vm486_vm1 = vcmp.lt.s32.totalorder %v2650_v12, 15  ;;  %s1891_s10 = sshll.u32 %s1888_s12, 4  ;;  %s1892_s10 = int_to_ptr.hbm [resolvable:$true] %s1891_s10 }
  0x52   : > { %2166 = vperm.xlu2 %2144, %v2165_v47   ;;  %v2185_v32 = vpack.i.bf16 %v478_v26, %v477_v25  ;;  %v519_v23 = vsel %vm487_vm14, 1.0, %v2442_v9  ;;  %v520_v24 = vsel %vm488_vm15, 1.0, %v2442_v9  ;;  %vm451_vm2 = vcmp.gt.s32.totalorder %v2838_v28, 0  ;;  %s2336_s25 = sshra.s32 %s1892_s10, 4  ;;  %s2337_s25 = int_to_ptr.hbm [resolvable:$true] %s2336_s25 }
  0x53   : > { %2161 = vperm.xlu1 %2133, %v2160_v52   ;;  %vm452_vm3 = vcmp.gt.s32.totalorder %v2843_v29, 0  ;;  %v517_v33 = vsel %vm485_vm0, 1.0, %v2442_v9  ;;  %v518_v34 = vsel %vm486_vm1, 1.0, %v2442_v9  ;;  %v2210_v37 = vpack.i.bf16 %v520_v24, %v519_v23  ;;  %s2338_s14 = scalar_lea.hbm %s2337_s25, 256  ;;  %p2343_p10 = scmp.lt.s32.totalorder %s2337_s25, %s4900_s8 }
  0x54   : > { %v483_v8 = vsel %vm451_vm2, 1.0, %v2442_v9  ;;  %v484_v12 = vsel %vm452_vm3, 1.0, %v2442_v9  ;;  %v2205_v40 = vpack.i.bf16 %v518_v34, %v517_v33  ;;  %vm493_vm4 = vcmp.lt.s32.totalorder %v2619_v4, 15  ;;  %v2950_v34 = vld [vmem:[%s2610_s5 + $0x80] sm:$0xff]  ;;  %p2339_p7 = scmp.ne.s32.totalorder %s2337_s25, %s2338_s14  ;;  %p2344_p11 = scmp.lt.s32.totalorder %s2342_s29, %s2338_s14 }
  0x55   : > { %2156 = vperm.xlu0 %2122, %v2155_v55   ;;  %vm494_vm5 = vcmp.lt.s32.totalorder %v2624_v5, 15  ;;  %v2200_v41 = vpack.i.bf16 %v484_v12, %v483_v8  ;;  %vm491_vm6 = vcmp.lt.s32.totalorder %v2667_v18, 15  ;;  %vm492_vm7 = vcmp.lt.s32.totalorder %v2674_v20, 15  ;;  %4605 = vst [vmem:[#allocation23_spill] sm:$0xff] %v2950_v34 }
  0x56   : > { %vm489_vm8 = vcmp.lt.s32.totalorder %v2629_v6, 15  ;;  %vm490_vm9 = vcmp.lt.s32.totalorder %v2636_v7, 15  ;;  %v525_v42 = vsel %vm493_vm4, 1.0, %v2442_v9  ;;  %v526_v43 = vsel %vm494_vm5, 1.0, %v2442_v9  ;;  %p2340_p8 = pnand %p2339_p7, %p2574_p13  ;;  %p2345_p12 = por %p2344_p11, %p2343_p10 }
  0x57   : > { %v523_v44 = vsel %vm491_vm6, 1.0, %v2442_v9  ;;  %v524_v4 = vsel %vm492_vm7, 1.0, %v2442_v9  ;;  %v2225_v5 = vpack.i.bf16 %v526_v43, %v525_v42  ;;  %v521_v18 = vsel %vm489_vm8, 1.0, %v2442_v9  ;;  %v2967_v42 = vld [vmem:[%s2610_s5 + $0x78] sm:$0xff] }
  0x58   : > { %v522_v20 = vsel %vm490_vm9, 1.0, %v2442_v9  ;;  %v2220_v47 = vpack.i.bf16 %v524_v4, %v523_v44  ;;  %vm499_vm10 = vcmp.lt.s32.totalorder %v2713_v35, 15  ;;  %vm500_vm11 = vcmp.lt.s32.totalorder %v2718_v36, 15  ;;  %4608 = vst [vmem:[#allocation26_spill] sm:$0xff] %v2967_v42  ;;  %p2341_p9 = pneg %p2340_p8 }
  0x59   : > { %v2215_v6 = vpack.i.bf16 %v522_v20, %v521_v18  ;;  %vm497_vm12 = vcmp.lt.s32.totalorder %v2725_v38, 15  ;;  %vm498_vm13 = vcmp.lt.s32.totalorder %v2730_v39, 15  ;;  %v531_v7 = vsel %vm499_vm10, 1.0, %v2442_v9 }
  0x5a   : > { %2181 = vperm.xlu2 %2144, %v2180_v62   ;;  %v532_v48 = vsel %vm500_vm11, 1.0, %v2442_v9  ;;  %vm495_vm14 = vcmp.lt.s32.totalorder %v2657_v16, 15  ;;  %vm496_vm15 = vcmp.lt.s32.totalorder %v2662_v17, 15  ;;  %v529_v49 = vsel %vm497_vm12, 1.0, %v2442_v9  ;;  %p2346_p0 = pnand %p2345_p12, %p2341_p9 }
  0x5b   : > { %2176 = vperm.xlu1 %2133, %v2175_v3   ;;  %v530_v35 = vsel %vm498_vm13, 1.0, %v2442_v9  ;;  %v2240_v36 = vpack.i.bf16 %v532_v48, %v531_v7  ;;  %v527_v38 = vsel %vm495_vm14, 1.0, %v2442_v9  ;;  %v528_v39 = vsel %vm496_vm15, 1.0, %v2442_v9 }
  0x5c   : > { %v2235_v52 = vpack.i.bf16 %v530_v35, %v529_v49  ;;  %vm505_vm0 = vcmp.lt.s32.totalorder %v2755_v50, 15  ;;  %vm506_vm1 = vcmp.lt.s32.totalorder %v2760_v51, 15  ;;  %v2230_v55 = vpack.i.bf16 %v528_v39, %v527_v38  ;;  %v3009_v38 = vld [vmem:[%s2610_s5 + $0xb0] sm:$0xff]  ;;  %v3012_v39 = vld [vmem:[%s2610_s5 + $0xb8] sm:$0xff] }
  0x5d   : > { %2171 = vperm.xlu0 %2122, %v2170_v13   ;;  %vm503_vm2 = vcmp.lt.s32.totalorder %v2767_v53, 15  ;;  %vm504_vm3 = vcmp.lt.s32.totalorder %v2772_v54, 15  ;;  %v537_v16 = vsel %vm505_vm0, 1.0, %v2442_v9  ;;  %v538_v17 = vsel %vm506_vm1, 1.0, %v2442_v9  ;;  %4611 = vst [vmem:[#allocation29_spill] sm:$0xff] %v3009_v38 }
  0x5e   : > { %vm501_vm4 = vcmp.lt.s32.totalorder %v2701_v30, 15  ;;  %vm502_vm5 = vcmp.lt.s32.totalorder %v2706_v31, 15  ;;  %v535_v56 = vsel %vm503_vm2, 1.0, %v2442_v9  ;;  %v536_v50 = vsel %vm504_vm3, 1.0, %v2442_v9  ;;  %4612 = vst [vmem:[#allocation30_spill] sm:$0xff] %v3012_v39 }
  0x5f   : > { %v2255_v51 = vpack.i.bf16 %v538_v17, %v537_v16  ;;  %v533_v53 = vsel %vm501_vm4, 1.0, %v2442_v9  ;;  %v534_v54 = vsel %vm502_vm5, 1.0, %v2442_v9  ;;  %v2250_v57 = vpack.i.bf16 %v536_v50, %v535_v56  ;;  %v3033_v56 = vld [vmem:[%s2610_s5 + $0x20] sm:$0xff]  ;;  %v3036_v50 = vld [vmem:[%s2610_s5 + $0x28] sm:$0xff] }
  0x60   : > { %vm511_vm6 = vcmp.lt.s32.totalorder %v2799_v1, 15  ;;  %vm512_vm7 = vcmp.lt.s32.totalorder %v2804_v2, 15  ;;  %v2245_v58 = vpack.i.bf16 %v534_v54, %v533_v53  ;;  %vm509_vm8 = vcmp.lt.s32.totalorder %v2816_v10, 15  ;;  %v2910_v10 = vld [vmem:[%s2610_s5 + $0x48] sm:$0xff]  ;;  %4613 = vst [vmem:[#allocation31_spill] sm:$0xff] %v3033_v56 }
  0x61   : > { %vm510_vm9 = vcmp.lt.s32.totalorder %v2821_v11, 15  ;;  %v543_v30 = vsel %vm511_vm6, 1.0, %v2442_v9  ;;  %v544_v31 = vsel %vm512_vm7, 1.0, %v2442_v9  ;;  %vm507_vm10 = vcmp.lt.s32.totalorder %v2743_v45, 15  ;;  %4599 = vst [vmem:[#allocation17_spill] sm:$0xff] %v2910_v10  ;;  %v2915_v11 = vld [vmem:[%s2610_s5 + $0x38] sm:$0xff] }
  0x62   : > { %2196 = vperm.xlu2 %2144, %v2195_v22   ;;  %vm508_vm11 = vcmp.lt.s32.totalorder %v2748_v46, 15  ;;  %v541_v59 = vsel %vm509_vm8, 1.0, %v2442_v9  ;;  %v542_v62 = vsel %vm510_vm9, 1.0, %v2442_v9  ;;  %v2270_v63 = vpack.i.bf16 %v544_v31, %v543_v30  ;;  %v2907_v46 = vld [vmem:[%s2610_s5 + $0x40] sm:$0xff]  ;;  %v3061_v31 = vld [vmem:[%s2610_s5 + $0x8] sm:$0xff] }
  0x63   : > { %2191 = vperm.xlu1 %2133, %v2190_v27   ;;  %v539_v0 = vsel %vm507_vm10, 1.0, %v2442_v9  ;;  %v540_v1 = vsel %vm508_vm11, 1.0, %v2442_v9  ;;  %v2265_v2 = vpack.i.bf16 %v542_v62, %v541_v59  ;;  %v388_v3 = vlaneseq  ;;  %4598 = vst [vmem:[#allocation16_spill] sm:$0xff] %v2907_v46  ;;  %v2925_v22 = vld [vmem:[%s286_s15] sm:$0x7] }
  0x64   : > { %v2260_v45 = vpack.i.bf16 %v540_v1, %v539_v0  ;;  %vm515_vm12 = vcmp.lt.s32.totalorder %v2838_v28, 15  ;;  %vm516_vm13 = vcmp.lt.s32.totalorder %v2843_v29, 15  ;;  %vm513_vm14 = vcmp.lt.s32.totalorder %v2787_v60, 15  ;;  %4600 = vst [vmem:[#allocation18_spill] sm:$0xff] %v2925_v22  ;;  %v2928_v27 = vld [vmem:[%s286_s15 + $0x8] sm:$0x7] }
  0x65   : > { %2186 = vperm.xlu0 %2122, %v2185_v32   ;;  %vm514_vm15 = vcmp.lt.s32.totalorder %v2792_v61, 15  ;;  %v547_v13 = vsel %vm515_vm12, 1.0, %v2442_v9  ;;  %v548_v14 = vsel %vm516_vm13, 1.0, %v2442_v9  ;;  %v2919_v15 = vshrl.u32 %v388_v3, 7  ;;  %4601 = vst [vmem:[#allocation19_spill] sm:$0xff] %v2928_v27  ;;  %v2931_v28 = vld [vmem:[%s2610_s5 + $0x50] sm:$0xff] }
  0x66   : > { %v685_v19 = vrot.slane %v2907_v46, 7  ;;  %v686_v21 = vrot.slane %v2910_v10, 7  ;;  %v545_v60 = vsel %vm513_vm14, 1.0, %v2442_v9  ;;  %v546_v61 = vsel %vm514_vm15, 1.0, %v2442_v9  ;;  %4602 = vst [vmem:[#allocation20_spill] sm:$0xff] %v2931_v28  ;;  %v2934_v29 = vld [vmem:[%s2610_s5 + $0x58] sm:$0xff] }
  0x67   : > { %v4517_v25 = vrot.slane %v2915_v11, 7  ;;  %v2280_v26 = vpack.i.bf16 %v548_v14, %v547_v13  ;;  %4603 = vst [vmem:[#allocation21_spill] sm:$0xff] %v2934_v29  ;;  %vm709_vm0 = vcmp.lt.s32.totalorder %v2919_v15, 1  ;;  %v2937_v32 = vld [vmem:[%s286_s15 + $0x4] sm:$0x7]  ;;  %v2275_v23 = vpack.i.bf16 %v546_v61, %v545_v60  ;;  %v3085_v13 = vld [vmem:[%s2610_s5 + $0xf8] sm:$0xff] }
  0x68   : > { %4604 = vst [vmem:[#allocation22_spill] sm:$0xff] %v2937_v32  ;;  %v2941_v9 = vsel %vm709_vm0, %v685_v19, %v686_v21  ;;  %v2944_v24 = vperm.slane %v2925_v22, 0  ;;  %v2947_v33 = vperm.slane %v2925_v22, 1  ;;  %v2962_v12 = vperm.slane %v2928_v27, 1  ;;  %v3058_v30 = vld [vmem:[%s2610_s5] sm:$0xff] }
  0x69   : > { %v2959_v8 = vsel %vm709_vm0, %v4517_v25, %v685_v19  ;;  %v2978_v4 = vperm.slane %v2928_v27, 0  ;;  %v2988_v20 = vperm.slane %v2937_v32, 0  ;;  %v4516_v35 = vrot.slane %v2967_v42, 7  ;;  %4615 = vst [vmem:[#allocation33_spill] sm:$0xff] %v3058_v30 }
  0x6a   : > { %2211 = vperm.xlu2 %2144, %v2210_v37   ;;  %v2953_v37 = vld [vmem:[%s2610_s5 + $0x88] sm:$0xff]  ;;  %4607 = vst [vmem:[#allocation25_spill] sm:$0xff] %v2962_v12  ;;  %v2971_v43 = vmul.f32 %v2947_v33, %v2907_v46  ;;  %v2975_v44 = vmul.f32 %v2947_v33, %v2910_v10  ;;  %v2985_v18 = vmul.f32 %v2962_v12, %v2907_v46  ;;  %v4518_v0 = vrot.slane %v3012_v39, 7 }
  0x6b   : > { %2206 = vperm.xlu1 %2133, %v2205_v40   ;;  %4606 = vst [vmem:[#allocation24_spill] sm:$0xff] %v2953_v37  ;;  %v687_v40 = vrot.slane %v2931_v28, 7  ;;  %v2994_v7 = vmul.f32 %v2962_v12, %v2910_v10  ;;  %v3026_v16 = vmul.f32 %v2947_v33, %v2931_v28  ;;  %v3030_v17 = vmul.f32 %v2947_v33, %v2934_v29 }
  0x6c   : > { %v3044_v53 = vmul.f32 %v2962_v12, %v2934_v29  ;;  %4616 = vst [vmem:[#allocation34_spill] sm:$0xff] %v3061_v31  ;;  %v681_v3 = vrot.slane %v3033_v56, 7  ;;  %v3089_v14 = vmul.f32 %v2947_v33, %v2953_v37  ;;  %v3096_v61 = vmul.f32 %v2962_v12, %v2950_v34 }
  0x6d   : > { %2201 = vperm.xlu0 %2122, %v2200_v41   ;;  %v4515_v41 = vrot.slane %v2934_v29, 7  ;;  %4617 = vst [vmem:[#allocation35_spill] sm:$0xff] %v3085_v13  ;;  %v3205_v27 = vmul.f32 %v2947_v33, %v3058_v30  ;;  %v3209_v22 = vmul.f32 %v2947_v33, %v3061_v31  ;;  %vm966_vm1 = vcmp.lt.s32.totalorder %v2919_v15, 7 }
  0x6f   : > { %4629 = vst [vmem:[#allocation43_spill] sm:$0xff] %v3205_v27 }
  0x70   : > { %4630 = vst [vmem:[#allocation44_spill] sm:$0xff] %v3209_v22 }
  0x72   : > { %2226 = vperm.xlu2 %2144, %v2225_v5   ;;  %v2981_v5 = vperm.slane %v2937_v32, 1 }
  0x73   : > { %2221 = vperm.xlu1 %2133, %v2220_v47   ;;  %v693_v47 = vrot.slane %v2950_v34, 7 }
  0x74   : > { %4609 = vst [vmem:[#allocation27_spill] sm:$0xff] %v2981_v5  ;;  %v2998_v48 = vmul.f32 %v2981_v5, %v2907_v46  ;;  %v3002_v49 = vmul.f32 %v2981_v5, %v2910_v10  ;;  %v3048_v54 = vmul.f32 %v2981_v5, %v2931_v28  ;;  %v3161_v46 = vmul.f32 %v2981_v5, %v3009_v38 }
  0x75   : > { %2216 = vperm.xlu0 %2122, %v2215_v6   ;;  %v4514_v6 = vrot.slane %v2953_v37, 7  ;;  %v3076_v1 = vsel %vm709_vm0, %v4516_v35, %v693_v47  ;;  %v3124_v35 = vmul.f32 %v2947_v33, %v3009_v38  ;;  %v3227_v27 = vmul.f32 %v2981_v5, %v3058_v30 }
  0x77   : > { %v3067_v59 = vsel %vm709_vm0, %v693_v47, %v4514_v6  ;;  %4635 = vst [vmem:[#allocation49_spill] sm:$0xff] %v3227_v27 }
  0x7a   : > { %2241 = vperm.xlu2 %2144, %v2240_v36   ;;  %v3006_v36 = vld [vmem:[%s2610_s5 + $0xa8] sm:$0xff] }
  0x7b   : > { %2236 = vperm.xlu1 %2133, %v2235_v52   ;;  %4610 = vst [vmem:[#allocation28_spill] sm:$0xff] %v3006_v36  ;;  %v3018_v52 = vsel %vm709_vm0, %v687_v40, %v4515_v41  ;;  %v4521_v62 = vrot.slane %v3006_v36, 7  ;;  %v3165_v36 = vmul.f32 %v2981_v5, %v3012_v39 }
  0x7d   : > { %2231 = vperm.xlu0 %2122, %v2230_v55   ;;  %v3022_v55 = vsel %vm709_vm0, %v686_v21, %v687_v40  ;;  %v677_v21 = vrot.slane %v3058_v30, 7  ;;  %v3108_v40 = vmul.f32 %v2981_v5, %v2953_v37  ;;  %4621 = vst [vmem:[#allocation36_spill] sm:$0xff] %v3165_v36  ;;  %v3239_v36 = vmul.f32 %v2981_v5, %v3061_v31 }
  0x7f   : > { %4638 = vst [vmem:[#allocation52_spill] sm:$0xff] %v3239_v36 }
  0x82   : > { %2256 = vperm.xlu2 %2144, %v2255_v51   ;;  %v3040_v51 = vmul.f32 %v2962_v12, %v2931_v28 }
  0x83   : > { %2251 = vperm.xlu1 %2133, %v2250_v57   ;;  %v3052_v57 = vmul.f32 %v2981_v5, %v2934_v29 }
  0x85   : > { %2246 = vperm.xlu0 %2122, %v2245_v58   ;;  %v3055_v58 = vld [vmem:[%s2610_s5 + $0x18] sm:$0xff] }
  0x86   : > { %4614 = vst [vmem:[#allocation32_spill] sm:$0xff] %v3055_v58 }
  0x8a   : > { %2271 = vperm.xlu2 %2144, %v2270_v63   ;;  %v699_v63 = vrot.slane %v3009_v38, 7 }
  0x8b   : > { %2266 = vperm.xlu1 %2133, %v2265_v2   ;;  %v3080_v2 = vmul.f32 %v2947_v33, %v2950_v34 }
  0x8c   : > { %v3114_v6 = vsel %vm709_vm0, %v699_v63, %v4518_v0  ;;  %v3120_v41 = vsel %vm709_vm0, %v4521_v62, %v699_v63  ;;  %v4618_v0 = vrot.slane %v3036_v50, 7  ;;  %v3139_v63 = vmul.f32 %v2962_v12, %v3009_v38 }
  0x8d   : > { %2261 = vperm.xlu0 %2122, %v2260_v45   ;;  %v3129_v45 = vmul.f32 %v2947_v33, %v3012_v39  ;;  %v3143_v62 = vmul.f32 %v2962_v12, %v3012_v39  ;;  %v3192_v38 = vmul.f32 %v2981_v5, %v3033_v56  ;;  %v3196_v39 = vmul.f32 %v2981_v5, %v3036_v50 }
  0x8f   : > { %4627 = vst [vmem:[#allocation41_spill] sm:$0xff] %v3192_v38  ;;  %v3219_v38 = vld [vmem:[%s2610_s5 + $0xe0] sm:$0xff] }
  0x90   : > { %4628 = vst [vmem:[#allocation42_spill] sm:$0xff] %v3196_v39  ;;  %v3216_v39 = vld [vmem:[%s2610_s5 + $0xd8] sm:$0xff] }
  0x91   : > { %4632 = vst [vmem:[#allocation46_spill] sm:$0xff] %v3216_v39 }
  0x92   : > { %4633 = vst [vmem:[#allocation47_spill] sm:$0xff] %v3219_v38 }
  0x93   : > { %2281 = vperm.xlu1 %2133, %v2280_v26   ;;  %v3100_v26 = vmul.f32 %v2962_v12, %v2953_v37  ;;  %v4620_v37 = vrot.slane %v3061_v31, 7 }
  0x95   : > { %2276 = vperm.xlu0 %2122, %v2275_v23   ;;  %v3104_v23 = vmul.f32 %v2981_v5, %v2950_v34  ;;  %v3135_v34 = vsel %vm709_vm0, %v681_v3, %v4618_v0  ;;  %v3155_v0 = vsel %vm709_vm0, %v677_v21, %v4620_v37  ;;  %v3173_v37 = vmul.f32 %v2947_v33, %v3036_v50 }
  0x97   : > { %4623 = vst [vmem:[#allocation38_spill] sm:$0xff] %v3173_v37 }
  0x9c   : > { %v2147_v47 = vpop.permute.xlu2 %2146 }
  0x9d   : > { %v2149_v60 = vunpack.i.h.bf16 %v2147_v47  ;;  %v2148_v19 = vunpack.i.l.bf16 %v2147_v47  ;;  %v4619_v47 = vrot.slane %v3055_v58, 7 }
  0x9f   : > { %v3149_v25 = vsel %vm709_vm0, %v4619_v47, %v681_v3  ;;  %v910_v28 = vmul.f32 %v2148_v19, %v2959_v8  ;;  %v911_v10 = vmul.f32 %v2149_v60, %v2941_v9  ;;  %v3169_v3 = vmul.f32 %v2947_v33, %v3033_v56 }
  0xa0   : > { %v3177_v9 = vmul.f32 %v2962_v12, %v3033_v56  ;;  %v4625_v8 = vrot.slane %v3085_v13, 7  ;;  %v3188_v47 = vmul.f32 %v2962_v12, %v3036_v50  ;;  %v3213_v56 = vmul.f32 %v2962_v12, %v3058_v30 }
  0xa1   : > { %4622 = vst [vmem:[#allocation37_spill] sm:$0xff] %v3169_v3  ;;  %v1200_v60 = vmul.f32 %v2944_v24, %v910_v28  ;;  %v1201_v13 = vmul.f32 %v2944_v24, %v911_v10  ;;  %v1526_v29 = vmul.f32 %v2988_v20, %v910_v28  ;;  %v1527_v32 = vmul.f32 %v2988_v20, %v911_v10 }
  0xa2   : > { %4624 = vst [vmem:[#allocation39_spill] sm:$0xff] %v3177_v9  ;;  %v3183_v19 = vsel %vm709_vm0, %v4625_v8, %v677_v21  ;;  %v1363_v21 = vmul.f32 %v2978_v4, %v910_v28  ;;  %v1364_v8 = vmul.f32 %v2978_v4, %v911_v10  ;;  %v3223_v10 = vmul.f32 %v2962_v12, %v3061_v31 }
  0xa3   : > { %4626 = vst [vmem:[#allocation40_spill] sm:$0xff] %v3188_v47  ;;  %v3230_v47 = vld [vmem:[%s2610_s5 + $0xe8] sm:$0xff]  ;;  %v705_v9 = vrot.slane %v3219_v38, 7  ;;  %v3245_v30 = vadd.f32 %v2975_v44, %v1201_v13  ;;  %v4645_v44 = vrot.slane %v3216_v39, 7  ;;  %v3302_v39 = vmul.f32 %v2981_v5, %v3219_v38 }
  0xa4   : > { %4631 = vst [vmem:[#allocation45_spill] sm:$0xff] %v3213_v56  ;;  %v2152_v28 = vpop.permute.xlu2 %2151  ;;  %v3235_v56 = vadd.f32 %v2971_v43, %v1200_v60  ;;  %v3248_v27 = vadd.f32 %v2985_v18, %v1363_v21  ;;  %v3251_v22 = vadd.f32 %v2994_v7, %v1364_v8  ;;  %v3254_v43 = vadd.f32 %v2998_v48, %v1526_v29  ;;  %v3278_v48 = vld [vmem:[%s2610_s5 + $0x10] sm:$0xff] }
  0xa5   : > { %4634 = vst [vmem:[#allocation48_spill] sm:$0xff] %v3223_v10  ;;  %v2154_v37 = vunpack.i.h.bf16 %v2152_v28  ;;  %v2153_v3 = vunpack.i.l.bf16 %v2152_v28  ;;  %v3242_v10 = vld [vmem:[%s2610_s5 + $0x30] sm:$0xff]  ;;  %v3257_v60 = vadd.f32 %v3002_v49, %v1527_v32  ;;  %v4544_v36 = vrot.slane %v3230_v47, 7 }
  0xa6   : > { %4636 = vst [vmem:[#allocation50_spill] sm:$0xff] %v3230_v47  ;;  %v3266_v18 = vsel %vm709_vm0, %v4645_v44, %v705_v9  ;;  %v3270_v7 = vmul.f32 %v2947_v33, %v3219_v38  ;;  %v3274_v29 = vmul.f32 %v2947_v33, %v3230_v47  ;;  %v683_v32 = vrot.slane %v3242_v10, 7 }
  0xa7   : > { %4637 = vst [vmem:[#allocation51_spill] sm:$0xff] %v3235_v56  ;;  %v912_v28 = vmul.f32 %v2153_v3, %v3022_v55  ;;  %v913_v56 = vmul.f32 %v2154_v37, %v3018_v52  ;;  %v3288_v21 = vmul.f32 %v2962_v12, %v3219_v38  ;;  %v3292_v8 = vmul.f32 %v2962_v12, %v3230_v47 }
  0xa8   : > { %4639 = vst [vmem:[#allocation53_spill] sm:$0xff] %v3242_v10  ;;  %v3298_v44 = vsel %vm709_vm0, %v705_v9, %v4544_v36  ;;  %v4649_v9 = vrot.slane %v2915_v11, 7  ;;  %v4650_v38 = vrot.slane %v3036_v50, 7  ;;  %v3345_v50 = vmul.f32 %v2947_v33, %v2915_v11 }
  0xa9   : > { %4640 = vst [vmem:[#allocation54_spill] sm:$0xff] %v3245_v30  ;;  %v1202_v49 = vmul.f32 %v2944_v24, %v912_v28  ;;  %v1203_v52 = vmul.f32 %v2944_v24, %v913_v56  ;;  %v1365_v55 = vmul.f32 %v2978_v4, %v912_v28  ;;  %v1366_v13 = vmul.f32 %v2978_v4, %v913_v56 }
  0xaa   : > { %4641 = vst [vmem:[#allocation55_spill] sm:$0xff] %v3248_v27  ;;  %v1528_v3 = vmul.f32 %v2988_v20, %v912_v28  ;;  %v1529_v37 = vmul.f32 %v2988_v20, %v913_v56  ;;  %v3306_v56 = vmul.f32 %v2981_v5, %v3230_v47  ;;  %v679_v28 = vrot.slane %v3278_v48, 7 }
  0xab   : > { %4642 = vst [vmem:[#allocation56_spill] sm:$0xff] %v3251_v22  ;;  %v3310_v22 = vadd.f32 %v3026_v16, %v1202_v49  ;;  %v3313_v30 = vadd.f32 %v3030_v17, %v1203_v52  ;;  %v3319_v36 = vsel %vm709_vm0, %v683_v32, %v4649_v9  ;;  %v3325_v47 = vsel %vm709_vm0, %v4650_v38, %v683_v32 }
  0xac   : > { %4643 = vst [vmem:[#allocation57_spill] sm:$0xff] %v3254_v43  ;;  %v3328_v43 = vadd.f32 %v3040_v51, %v1365_v55  ;;  %v3331_v16 = vadd.f32 %v3044_v53, %v1366_v13  ;;  %v3334_v52 = vadd.f32 %v3048_v54, %v1528_v3  ;;  %v3337_v9 = vadd.f32 %v3052_v57, %v1529_v37  ;;  %v3378_v3 = vld [vmem:[%s2610_s5 + $0x68] sm:$0xff]  ;;  %v3381_v37 = vld [vmem:[%s2610_s5 + $0x70] sm:$0xff] }
  0xad   : > { %4644 = vst [vmem:[#allocation58_spill] sm:$0xff] %v3257_v60  ;;  %v2167_v60 = vpop.permute.xlu2 %2166  ;;  %v3341_v38 = vmul.f32 %v2947_v33, %v3242_v10  ;;  %v3355_v54 = vmul.f32 %v2962_v12, %v2915_v11  ;;  %v3359_v57 = vmul.f32 %v2981_v5, %v3242_v10  ;;  %v3363_v32 = vmul.f32 %v2981_v5, %v2915_v11 }
  0xae   : > { %4646 = vst [vmem:[#allocation59_spill] sm:$0xff] %v3278_v48  ;;  %v2169_v17 = vunpack.i.h.bf16 %v2167_v60  ;;  %v2168_v49 = vunpack.i.l.bf16 %v2167_v60  ;;  %v3351_v60 = vmul.f32 %v2962_v12, %v3242_v10  ;;  %v4656_v55 = vrot.slane %v3061_v31, 7 }
  0xaf   : > { %4647 = vst [vmem:[#allocation60_spill] sm:$0xff] %v3310_v22  ;;  %v3415_v31 = vmul.f32 %v2981_v5, %v3278_v48  ;;  %v3419_v27 = vmul.f32 %v2981_v5, %v3055_v58 }
  0xb0   : > { %4648 = vst [vmem:[#allocation61_spill] sm:$0xff] %v3313_v30  ;;  %v918_v51 = vmul.f32 %v2168_v49, %v3076_v1  ;;  %v919_v53 = vmul.f32 %v2169_v17, %v3067_v59  ;;  %v4655_v1 = vrot.slane %v3055_v58, 7  ;;  %v3375_v13 = vsel %vm709_vm0, %v4656_v55, %v679_v28 }
  0xb1   : > { %4651 = vst [vmem:[#allocation62_spill] sm:$0xff] %v3328_v43  ;;  %v3395_v55 = vmul.f32 %v2947_v33, %v3055_v58  ;;  %v3403_v43 = vmul.f32 %v2962_v12, %v3055_v58 }
  0xb2   : > { %4652 = vst [vmem:[#allocation63_spill] sm:$0xff] %v3331_v16  ;;  %v3369_v59 = vsel %vm709_vm0, %v679_v28, %v4655_v1  ;;  %v1208_v17 = vmul.f32 %v2944_v24, %v918_v51  ;;  %v1209_v11 = vmul.f32 %v2944_v24, %v919_v53  ;;  %v1371_v49 = vmul.f32 %v2978_v4, %v918_v51 }
  0xb3   : > { %4653 = vst [vmem:[#allocation64_spill] sm:$0xff] %v3334_v52  ;;  %v1534_v1 = vmul.f32 %v2988_v20, %v918_v51  ;;  %v1535_v52 = vmul.f32 %v2988_v20, %v919_v53  ;;  %v3391_v28 = vmul.f32 %v2947_v33, %v3278_v48  ;;  %v3399_v16 = vmul.f32 %v2962_v12, %v3278_v48 }
  0xb4   : > { %4654 = vst [vmem:[#allocation65_spill] sm:$0xff] %v3337_v9  ;;  %v1372_v9 = vmul.f32 %v2978_v4, %v919_v53  ;;  %v691_v53 = vrot.slane %v3381_v37, 7  ;;  %v3408_v30 = vadd.f32 %v3080_v2, %v1208_v17  ;;  %v3411_v22 = vadd.f32 %v3089_v14, %v1209_v11 }
  0xb5   : > { %4657 = vst [vmem:[#allocation66_spill] sm:$0xff] %v3378_v3  ;;  %v2182_v10 = vpop.permute.xlu2 %2181  ;;  %v3428_v14 = vadd.f32 %v3104_v23, %v1534_v1  ;;  %v3431_v11 = vadd.f32 %v3108_v40, %v1535_v52 }
  0xb6   : > { %4658 = vst [vmem:[#allocation67_spill] sm:$0xff] %v3381_v37  ;;  %v3425_v51 = vadd.f32 %v3100_v26, %v1372_v9  ;;  %v2184_v2 = vunpack.i.h.bf16 %v2182_v10  ;;  %v2183_v17 = vunpack.i.l.bf16 %v2182_v10  ;;  %v4668_v10 = vrot.slane %v3378_v3, 7 }
  0xb7   : > { %4659 = vst [vmem:[#allocation68_spill] sm:$0xff] %v3403_v43  ;;  %v3422_v43 = vadd.f32 %v3096_v61, %v1371_v49  ;;  %v2125_v61 = vpop.permute.xlu0 %2124  ;;  %v4667_v49 = vrot.slane %v2967_v42, 7 }
  0xb8   : > { %4660 = vst [vmem:[#allocation69_spill] sm:$0xff] %v3408_v30  ;;  %v2136_v30 = vpop.permute.xlu1 %2135  ;;  %v924_v58 = vmul.f32 %v2183_v17, %v3120_v41  ;;  %v3445_v23 = vsel %vm709_vm0, %v4668_v10, %v691_v53  ;;  %v3451_v41 = vmul.f32 %v2947_v33, %v3381_v37  ;;  %v3477_v10 = vmul.f32 %v2981_v5, %v2967_v42 }
  0xb9   : > { %4661 = vst [vmem:[#allocation70_spill] sm:$0xff] %v3411_v22  ;;  %v2138_v22 = vunpack.i.h.bf16 %v2136_v30  ;;  %v2137_v48 = vunpack.i.l.bf16 %v2136_v30  ;;  %v3439_v26 = vsel %vm709_vm0, %v691_v53, %v4667_v49  ;;  %v3473_v49 = vmul.f32 %v2981_v5, %v3381_v37  ;;  %v4674_v5 = vld [vmem:[#allocation36_spill] sm:$0xff] }
  0xba   : > { %4662 = vst [vmem:[#allocation71_spill] sm:$0xff] %v3419_v27  ;;  %v925_v27 = vmul.f32 %v2184_v2, %v3114_v6  ;;  %v3455_v6 = vmul.f32 %v2947_v33, %v2967_v42  ;;  %v1214_v52 = vmul.f32 %v2944_v24, %v924_v58  ;;  %v1377_v1 = vmul.f32 %v2978_v4, %v924_v58 }
  0xbb   : > { %4663 = vst [vmem:[#allocation72_spill] sm:$0xff] %v3422_v43  ;;  %v906_v40 = vmul.f32 %v2137_v48, %v3149_v25  ;;  %v907_v30 = vmul.f32 %v2138_v22, %v3135_v34  ;;  %v2127_v2 = vunpack.i.h.bf16 %v2125_v61  ;;  %v2126_v25 = vunpack.i.l.bf16 %v2125_v61 }
  0xbc   : > { %4664 = vst [vmem:[#allocation73_spill] sm:$0xff] %v3425_v51  ;;  %v1215_v9 = vmul.f32 %v2944_v24, %v925_v27  ;;  %v1378_v53 = vmul.f32 %v2978_v4, %v925_v27  ;;  %v3463_v22 = vmul.f32 %v2962_v12, %v3381_v37  ;;  %v3467_v34 = vmul.f32 %v2962_v12, %v2967_v42 }
  0xbd   : > { %4665 = vst [vmem:[#allocation74_spill] sm:$0xff] %v3428_v14  ;;  %v1540_v48 = vmul.f32 %v2988_v20, %v924_v58  ;;  %v1541_v17 = vmul.f32 %v2988_v20, %v925_v27  ;;  %v3480_v61 = vadd.f32 %v3124_v35, %v1214_v52  ;;  %v1196_v14 = vmul.f32 %v2944_v24, %v906_v40  ;;  %v2197_v51 = vpop.permute.xlu2 %2196 }
  0xbe   : > { %4666 = vst [vmem:[#allocation75_spill] sm:$0xff] %v3431_v11  ;;  %v3483_v11 = vadd.f32 %v3129_v45, %v1215_v9  ;;  %v1197_v58 = vmul.f32 %v2944_v24, %v907_v30  ;;  %v3488_v27 = vadd.f32 %v3139_v63, %v1377_v1  ;;  %v3491_v43 = vadd.f32 %v3143_v62, %v1378_v53  ;;  %v4676_v53 = vld [vmem:[#allocation37_spill] sm:$0xff] }
  0xbf   : > { %4669 = vst [vmem:[#allocation76_spill] sm:$0xff] %v3480_v61  ;;  %v1359_v42 = vmul.f32 %v2978_v4, %v906_v40  ;;  %v1360_v37 = vmul.f32 %v2978_v4, %v907_v30  ;;  %v902_v52 = vmul.f32 %v2126_v25, %v3183_v19  ;;  %v903_v45 = vmul.f32 %v2127_v2, %v3155_v0  ;;  %v4682_v2 = vld [vmem:[#allocation40_spill] sm:$0xff] }
  0xc0   : > { %4670 = vst [vmem:[#allocation77_spill] sm:$0xff] %v3483_v11  ;;  %v2141_v35 = vpop.permute.xlu1 %2140  ;;  %v2199_v9 = vunpack.i.h.bf16 %v2197_v51  ;;  %v2198_v11 = vunpack.i.l.bf16 %v2197_v51  ;;  %v3498_v61 = vadd.f32 %v3161_v46, %v1540_v48  ;;  %v3501_v63 = vadd.f32 %v4674_v5, %v1541_v17  ;;  %v4680_v51 = vld [vmem:[#allocation39_spill] sm:$0xff] }
  0xc1   : > { %4671 = vst [vmem:[#allocation78_spill] sm:$0xff] %v3488_v27  ;;  %v1522_v62 = vmul.f32 %v2988_v20, %v906_v40  ;;  %v1523_v1 = vmul.f32 %v2988_v20, %v907_v30  ;;  %v4678_v27 = vld [vmem:[#allocation38_spill] sm:$0xff]  ;;  %v1192_v0 = vmul.f32 %v2944_v24, %v902_v52  ;;  %v1193_v19 = vmul.f32 %v2944_v24, %v903_v45 }
  0xc2   : > { %4672 = vst [vmem:[#allocation79_spill] sm:$0xff] %v3491_v43  ;;  %v3506_v43 = vadd.f32 %v4676_v53, %v1196_v14  ;;  %v3509_v12 = vadd.f32 %v4678_v27, %v1197_v58  ;;  %v3514_v46 = vadd.f32 %v4680_v51, %v1359_v42  ;;  %v3517_v5 = vadd.f32 %v4682_v2, %v1360_v37  ;;  %v4684_v58 = vld [vmem:[#allocation41_spill] sm:$0xff]  ;;  %v4686_v42 = vld [vmem:[#allocation42_spill] sm:$0xff]  ;;  %v4688_v37 = vld [vmem:[#allocation43_spill] sm:$0xff]  ;;  %v2130_v2 = vpop.permute.xlu0 %2129 }
  0xc3   : > { %4673 = vst [vmem:[#allocation80_spill] sm:$0xff] %v3498_v61  ;;  %v930_v40 = vmul.f32 %v2198_v11, %v3266_v18  ;;  %v931_v30 = vmul.f32 %v2199_v9, %v3298_v44  ;;  %v1355_v14 = vmul.f32 %v2978_v4, %v902_v52  ;;  %v1356_v25 = vmul.f32 %v2978_v4, %v903_v45  ;;  %v4689_v18 = vld [vmem:[#allocation44_spill] sm:$0xff] }
  0xc4   : > { %4675 = vst [vmem:[#allocation36_spill] sm:$0xff] %v3501_v63  ;;  %v1518_v48 = vmul.f32 %v2988_v20, %v902_v52  ;;  %v1519_v17 = vmul.f32 %v2988_v20, %v903_v45  ;;  %v3526_v27 = vadd.f32 %v4684_v58, %v1522_v62  ;;  %v3529_v53 = vadd.f32 %v4686_v42, %v1523_v1  ;;  %v4692_v63 = vld [vmem:[#allocation49_spill] sm:$0xff] }
  0xc5   : > { %4677 = vst [vmem:[#allocation37_spill] sm:$0xff] %v3506_v43  ;;  %v3532_v51 = vadd.f32 %v4688_v37, %v1192_v0  ;;  %v3535_v11 = vadd.f32 %v4689_v18, %v1193_v19  ;;  %v1220_v44 = vmul.f32 %v2944_v24, %v930_v40  ;;  %v1221_v9 = vmul.f32 %v2944_v24, %v931_v30  ;;  %v4690_v0 = vld [vmem:[#allocation45_spill] sm:$0xff]  ;;  %v4691_v19 = vld [vmem:[#allocation48_spill] sm:$0xff] }
  0xc6   : > { %4679 = vst [vmem:[#allocation38_spill] sm:$0xff] %v3509_v12  ;;  %v1383_v52 = vmul.f32 %v2978_v4, %v930_v40  ;;  %v1384_v45 = vmul.f32 %v2978_v4, %v931_v30  ;;  %v1546_v62 = vmul.f32 %v2988_v20, %v930_v40  ;;  %v1547_v1 = vmul.f32 %v2988_v20, %v931_v30 }
  0xc7   : > { %4681 = vst [vmem:[#allocation39_spill] sm:$0xff] %v3514_v46  ;;  %v2143_v58 = vunpack.i.h.bf16 %v2141_v35  ;;  %v2142_v42 = vunpack.i.l.bf16 %v2141_v35  ;;  %v3544_v37 = vadd.f32 %v4690_v0, %v1355_v14  ;;  %v3547_v18 = vadd.f32 %v4691_v19, %v1356_v25 }
  0xc8   : > { %4683 = vst [vmem:[#allocation40_spill] sm:$0xff] %v3517_v5  ;;  %v3550_v61 = vadd.f32 %v4692_v63, %v1518_v48  ;;  %v2162_v5 = vpop.permute.xlu1 %2161  ;;  %v2132_v30 = vunpack.i.h.bf16 %v2130_v2  ;;  %v2131_v12 = vunpack.i.l.bf16 %v2130_v2  ;;  %v3558_v35 = vadd.f32 %v3270_v7, %v1220_v44 }
  0xc9   : > { %4685 = vst [vmem:[#allocation41_spill] sm:$0xff] %v3526_v27  ;;  %v908_v46 = vmul.f32 %v2142_v42, %v3325_v47  ;;  %v909_v40 = vmul.f32 %v2143_v58, %v3319_v36  ;;  %v3561_v14 = vadd.f32 %v3274_v29, %v1221_v9  ;;  %v3564_v25 = vadd.f32 %v3288_v21, %v1383_v52 }
  0xca   : > { %4687 = vst [vmem:[#allocation42_spill] sm:$0xff] %v3529_v53  ;;  %v4693_v53 = vld [vmem:[#allocation52_spill] sm:$0xff]  ;;  %v3567_v63 = vadd.f32 %v3292_v8, %v1384_v45  ;;  %v3570_v48 = vadd.f32 %v3302_v39, %v1546_v62  ;;  %v3573_v47 = vadd.f32 %v3306_v56, %v1547_v1  ;;  %v2164_v36 = vunpack.i.h.bf16 %v2162_v5 }
  0xcb   : > { %v3553_v27 = vadd.f32 %v4693_v53, %v1519_v17  ;;  %4694 = vst [vmem:[#allocation43_spill] sm:$0xff] %v3558_v35  ;;  %v2163_v17 = vunpack.i.l.bf16 %v2162_v5  ;;  %v2212_v53 = vpop.permute.xlu2 %2211  ;;  %v1198_v7 = vmul.f32 %v2944_v24, %v908_v46  ;;  %v1199_v29 = vmul.f32 %v2944_v24, %v909_v40 }
  0xcc   : > { %4695 = vst [vmem:[#allocation44_spill] sm:$0xff] %v3561_v14  ;;  %v904_v44 = vmul.f32 %v2131_v12, %v3375_v13  ;;  %v905_v21 = vmul.f32 %v2132_v30, %v3369_v59  ;;  %v1361_v8 = vmul.f32 %v2978_v4, %v908_v46  ;;  %v1362_v9 = vmul.f32 %v2978_v4, %v909_v40 }
  0xcd   : > { %4696 = vst [vmem:[#allocation45_spill] sm:$0xff] %v3564_v25  ;;  %v1524_v39 = vmul.f32 %v2988_v20, %v908_v46  ;;  %v1525_v56 = vmul.f32 %v2988_v20, %v909_v40  ;;  %v2214_v45 = vunpack.i.h.bf16 %v2212_v53  ;;  %v3591_v62 = vadd.f32 %v3341_v38, %v1198_v7  ;;  %v4708_v7 = vld [vmem:[#allocation59_spill] sm:$0xff] }
  0xce   : > { %4697 = vst [vmem:[#allocation48_spill] sm:$0xff] %v3567_v63  ;;  %v1194_v52 = vmul.f32 %v2944_v24, %v904_v44  ;;  %v1195_v5 = vmul.f32 %v2944_v24, %v905_v21  ;;  %v1357_v2 = vmul.f32 %v2978_v4, %v904_v44  ;;  %v1358_v12 = vmul.f32 %v2978_v4, %v905_v21 }
  0xcf   : > { %4698 = vst [vmem:[#allocation49_spill] sm:$0xff] %v3570_v48  ;;  %v1520_v59 = vmul.f32 %v2988_v20, %v904_v44  ;;  %v1521_v13 = vmul.f32 %v2988_v20, %v905_v21  ;;  %v3594_v46 = vadd.f32 %v3345_v50, %v1199_v29  ;;  %v916_v1 = vmul.f32 %v2163_v17, %v3445_v23  ;;  %v2157_v29 = vpop.permute.xlu0 %2156  ;;  %v3622_v21 = vld [vmem:[%s2610_s5 + $0x60] sm:$0xff] }
  0xd0   : > { %4699 = vst [vmem:[#allocation52_spill] sm:$0xff] %v3573_v47  ;;  %v917_v58 = vmul.f32 %v2164_v36, %v3439_v26  ;;  %v3599_v42 = vadd.f32 %v3351_v60, %v1361_v8  ;;  %v3602_v0 = vadd.f32 %v3355_v54, %v1362_v9  ;;  %v3605_v19 = vadd.f32 %v3359_v57, %v1524_v39  ;;  %v4706_v26 = vld [vmem:[#allocation68_spill] sm:$0xff]  ;;  %v4707_v36 = vld [vmem:[#allocation71_spill] sm:$0xff] }
  0xd1   : > { %4700 = vst [vmem:[#allocation81_spill] sm:$0xff] %v3591_v62  ;;  %v3608_v38 = vadd.f32 %v3363_v32, %v1525_v56  ;;  %v1259_v50 = vadd.f32 %v3391_v28, %v1194_v52  ;;  %v1260_v40 = vadd.f32 %v3395_v55, %v1195_v5  ;;  %v1422_v23 = vadd.f32 %v3399_v16, %v1357_v2  ;;  %v4710_v8 = vld [vmem:[#allocation32_spill] sm:$0xff]  ;;  %v4711_v39 = vld [vmem:[#allocation31_spill] sm:$0xff]  ;;  %v4712_v52 = vld [vmem:[#allocation18_spill] sm:$0xff] }
  0xd2   : > { %4701 = vst [vmem:[#allocation82_spill] sm:$0xff] %v3594_v46  ;;  %v1423_v30 = vadd.f32 %v4706_v26, %v1358_v12  ;;  %v1585_v60 = vadd.f32 %v3415_v31, %v1520_v59  ;;  %v1586_v54 = vadd.f32 %v4707_v36, %v1521_v13  ;;  %v1206_v17 = vmul.f32 %v2944_v24, %v916_v1  ;;  %v4713_v2 = vld [vmem:[#allocation19_spill] sm:$0xff]  ;;  %v4714_v59 = vld [vmem:[#allocation22_spill] sm:$0xff] }
  0xd3   : > { %4702 = vst [vmem:[#allocation83_spill] sm:$0xff] %v3599_v42  ;;  %v4561_v57 = vrot.slane %v4708_v7, 1  ;;  %v1207_v32 = vmul.f32 %v2944_v24, %v917_v58  ;;  %v1369_v44 = vmul.f32 %v2978_v4, %v916_v1  ;;  %v1370_v28 = vmul.f32 %v2978_v4, %v917_v58  ;;  %v2227_v35 = vpop.permute.xlu2 %2226 }
  0xd4   : > { %4703 = vst [vmem:[#allocation84_spill] sm:$0xff] %v3602_v0  ;;  %v2213_v55 = vunpack.i.l.bf16 %v2212_v53  ;;  %v1532_v16 = vmul.f32 %v2988_v20, %v916_v1  ;;  %v1533_v31 = vmul.f32 %v2988_v20, %v917_v58  ;;  %v937_v9 = vrot.slane %v4710_v8, 1 }
  0xd5   : > { %4704 = vst [vmem:[#allocation85_spill] sm:$0xff] %v3605_v19  ;;  %v4560_v56 = vrot.slane %v4711_v39, 1  ;;  %v3629_v5 = vperm.slane %v4712_v52, 2  ;;  %v3632_v12 = vperm.slane %v4713_v2, 2  ;;  %v3635_v13 = vperm.slane %v4714_v59, 2 }
  0xd6   : > { %4705 = vst [vmem:[#allocation86_spill] sm:$0xff] %v3608_v38  ;;  %v2159_v53 = vunpack.i.h.bf16 %v2157_v29  ;;  %v995_v58 = vsel %vm966_vm1, %v4561_v57, %v937_v9  ;;  %v2158_v26 = vunpack.i.l.bf16 %v2157_v29  ;;  %v689_v36 = vrot.slane %v3622_v21, 7 }
  0xd7   : > { %4709 = vst [vmem:[#allocation68_spill] sm:$0xff] %v3622_v21  ;;  %v994_v1 = vsel %vm966_vm1, %v937_v9, %v4560_v56  ;;  %v3647_v8 = vadd.f32 %v3451_v41, %v1206_v17  ;;  %v3650_v52 = vadd.f32 %v3455_v6, %v1207_v32  ;;  %v1161_v2 = vmul.f32 %v2213_v55, %v995_v58  ;;  %v4716_v9 = vld [vmem:[#allocation21_spill] sm:$0xff] }
  0xd8   : > { %v1162_v59 = vmul.f32 %v2214_v45, %v994_v1  ;;  %v3653_v47 = vadd.f32 %v3463_v22, %v1369_v44  ;;  %v3656_v56 = vadd.f32 %v3467_v34, %v1370_v28  ;;  %v4715_v48 = vrot.slane %v3378_v3, 7 }
  0xd9   : > { %v4717_v57 = vrot.slane %v4716_v9, 7  ;;  %v1292_v6 = vmul.f32 %v3629_v5, %v1161_v2  ;;  %v1455_v22 = vmul.f32 %v3632_v12, %v1161_v2  ;;  %v1618_v17 = vmul.f32 %v3635_v13, %v1161_v2  ;;  %v3696_v9 = vld [vmem:[%s2610_s5 + $0x98] sm:$0xff] }
  0xda   : > { %v728_v29 = vsel %vm709_vm0, %v689_v36, %v4715_v48  ;;  %v1293_v45 = vmul.f32 %v3629_v5, %v1162_v59  ;;  %v1456_v34 = vmul.f32 %v3632_v12, %v1162_v59  ;;  %v1619_v32 = vmul.f32 %v3635_v13, %v1162_v59  ;;  %4721 = vst [vmem:[#allocation32_spill] sm:$0xff] %v3696_v9 }
  0xdb   : > { %v729_v41 = vsel %vm709_vm0, %v4717_v57, %v689_v36  ;;  %v915_v48 = vmul.f32 %v2159_v53, %v728_v29  ;;  %v3673_v28 = vadd.f32 %v3473_v49, %v1532_v16  ;;  %v3676_v57 = vadd.f32 %v3477_v10, %v1533_v31  ;;  %v3691_v10 = vld [vmem:[%s2809_s28] ss:$0 sm:$0xff]  ;;  %v2177_v29 = vpop.permute.xlu1 %2176 }
  0xdc   : > { %v914_v44 = vmul.f32 %v2158_v26, %v729_v41  ;;  %v1237_v55 = vmul.f32 %v2947_v33, %v3622_v21  ;;  %v1238_v1 = vmul.f32 %v2947_v33, %v3378_v3  ;;  %v3682_v58 = vadd.f32 %v1292_v6, %v1259_v50  ;;  %v4720_v26 = vld [vmem:[#allocation25_spill] sm:$0xff] }
  0xdd   : > { %v3684_v36 = vadd.f32 %v1293_v45, %v1260_v40  ;;  %v1400_v53 = vmul.f32 %v4720_v26, %v3622_v21  ;;  %v1401_v49 = vmul.f32 %v4720_v26, %v3378_v3  ;;  %v1650_v16 = vadd.f32 %v1618_v17, %v1585_v60  ;;  %v3699_v50 = vld [vmem:[%s2610_s5 + $0xa0] sm:$0xff]  ;;  %v4724_v17 = vld [vmem:[#allocation27_spill] sm:$0xff] }
  0xde   : > { %4718 = vst [vmem:[#allocation71_spill] sm:$0xff] %v3682_v58  ;;  %v1651_v2 = vadd.f32 %v1619_v32, %v1586_v54  ;;  %v1204_v31 = vmul.f32 %v2944_v24, %v914_v44  ;;  %v1205_v59 = vmul.f32 %v2944_v24, %v915_v48  ;;  %v3701_v40 = vadd.f32 %v1455_v22, %v1422_v23 }
  0xdf   : > { %4719 = vst [vmem:[#allocation59_spill] sm:$0xff] %v3684_v36  ;;  %v3703_v41 = vadd.f32 %v1456_v34, %v1423_v30  ;;  %v1367_v6 = vmul.f32 %v2978_v4, %v914_v44  ;;  %v1368_v60 = vmul.f32 %v2978_v4, %v915_v48  ;;  %v1530_v54 = vmul.f32 %v2988_v20, %v914_v44 }
  0xe0   : > { %4722 = vst [vmem:[#allocation18_spill] sm:$0xff] %v3701_v40  ;;  %v1531_v45 = vmul.f32 %v2988_v20, %v915_v48  ;;  %v1563_v32 = vmul.f32 %v4724_v17, %v3622_v21  ;;  %v1564_v63 = vmul.f32 %v4724_v17, %v3378_v3  ;;  %v2179_v25 = vunpack.i.h.bf16 %v2177_v29 }
  0xe1   : > { %4723 = vst [vmem:[#allocation19_spill] sm:$0xff] %v3703_v41  ;;  %v2178_v14 = vunpack.i.l.bf16 %v2177_v29  ;;  %v696_v23 = vrot.slane %v3696_v9, 7  ;;  %v697_v30 = vrot.slane %v3699_v50, 7  ;;  %v3716_v22 = vadd.f32 %v3691_v10, %v1650_v16  ;;  %v4731_v29 = vld [vmem:[#allocation28_spill] sm:$0xff] }
  0xe2   : > { %v3719_v34 = vadd.f32 %v3691_v10, %v1651_v2  ;;  %v3721_v44 = vadd.f32 %v1237_v55, %v1204_v31  ;;  %v3723_v48 = vadd.f32 %v1238_v1, %v1205_v59  ;;  %v3725_v41 = vadd.f32 %v1400_v53, %v1367_v6  ;;  %v4735_v31 = vld [vmem:[#allocation16_spill] sm:$0xff]  ;;  %v4736_v6 = vld [vmem:[#allocation17_spill] sm:$0xff] }
  0xe3   : > { %4725 = vst [vmem:[#allocation22_spill] sm:$0xff] %v3716_v22  ;;  %v3727_v40 = vadd.f32 %v1401_v49, %v1368_v60  ;;  %v4732_v36 = vrot.slane %v4731_v29, 7  ;;  %v721_v16 = vsel %vm709_vm0, %v696_v23, %v697_v30  ;;  %v3735_v43 = vadd.f32 %v1563_v32, %v1530_v54 }
  0xe4   : > { %4726 = vst [vmem:[#allocation21_spill] sm:$0xff] %v3719_v34  ;;  %v3737_v2 = vadd.f32 %v1564_v63, %v1531_v45  ;;  %v922_v55 = vmul.f32 %v2178_v14, %v721_v16  ;;  %v1245_v53 = vmul.f32 %v2947_v33, %v3699_v50  ;;  %v2228_v49 = vunpack.i.l.bf16 %v2227_v35  ;;  %v2172_v16 = vpop.permute.xlu0 %2171  ;;  %v2242_v34 = vpop.permute.xlu2 %2241 }
  0xe5   : > { %4727 = vst [vmem:[#allocation25_spill] sm:$0xff] %v3721_v44  ;;  %v720_v58 = vsel %vm709_vm0, %v697_v30, %v4732_v36  ;;  %v4562_v59 = vrot.slane %v4735_v31, 1  ;;  %v943_v60 = vrot.slane %v4736_v6, 1  ;;  %v1246_v30 = vmul.f32 %v2947_v33, %v4731_v29  ;;  %v3758_v6 = vld [vmem:[%s2610_s5 + $0x90] sm:$0xff] }
  0xe6   : > { %4728 = vst [vmem:[#allocation27_spill] sm:$0xff] %v3723_v48  ;;  %v923_v1 = vmul.f32 %v2179_v25, %v720_v58  ;;  %v1212_v36 = vmul.f32 %v2944_v24, %v922_v55  ;;  %v1408_v63 = vmul.f32 %v4720_v26, %v3699_v50  ;;  %v2229_v54 = vunpack.i.h.bf16 %v2227_v35  ;;  %v4737_v58 = vld [vmem:[#allocation20_spill] sm:$0xff] }
  0xe7   : > { %4729 = vst [vmem:[#allocation87_spill] sm:$0xff] %v3725_v41  ;;  %v1409_v14 = vmul.f32 %v4720_v26, %v4731_v29  ;;  %v1571_v25 = vmul.f32 %v4724_v17, %v3699_v50  ;;  %v989_v32 = vsel %vm966_vm1, %v4562_v59, %v943_v60  ;;  %v1375_v35 = vmul.f32 %v2978_v4, %v922_v55 }
  0xe8   : > { %4730 = vst [vmem:[#allocation88_spill] sm:$0xff] %v3727_v40  ;;  %v1213_v40 = vmul.f32 %v2944_v24, %v923_v1  ;;  %v1376_v41 = vmul.f32 %v2978_v4, %v923_v1  ;;  %v1539_v45 = vmul.f32 %v2988_v20, %v923_v1  ;;  %v4739_v48 = vrot.slane %v4737_v58, 1 }
  0xe9   : > { %4733 = vst [vmem:[#allocation28_spill] sm:$0xff] %v3735_v43  ;;  %v1538_v43 = vmul.f32 %v2988_v20, %v922_v55  ;;  %v1167_v44 = vmul.f32 %v2228_v49, %v989_v32  ;;  %v3771_v0 = vadd.f32 %v1245_v53, %v1212_v36  ;;  %v2173_v3 = vunpack.i.l.bf16 %v2172_v16  ;;  %v4741_v36 = vld [vmem:[#allocation24_spill] sm:$0xff] }
  0xea   : > { %4734 = vst [vmem:[#allocation89_spill] sm:$0xff] %v3737_v2  ;;  %v1572_v2 = vmul.f32 %v4724_v17, %v4731_v29  ;;  %v988_v59 = vsel %vm966_vm1, %v943_v60, %v4739_v48  ;;  %v695_v21 = vrot.slane %v3758_v6, 7  ;;  %v2174_v19 = vunpack.i.h.bf16 %v2172_v16 }
  0xeb   : > { %4738 = vst [vmem:[#allocation17_spill] sm:$0xff] %v3758_v6  ;;  %v1168_v42 = vmul.f32 %v2229_v54, %v988_v59  ;;  %v1298_v39 = vmul.f32 %v3629_v5, %v1167_v44  ;;  %v1461_v38 = vmul.f32 %v3632_v12, %v1167_v44  ;;  %v1624_v55 = vmul.f32 %v3635_v13, %v1167_v44 }
  0xec   : > { %v3777_v1 = vadd.f32 %v1246_v30, %v1213_v40  ;;  %v3779_v58 = vadd.f32 %v1408_v63, %v1375_v35  ;;  %v722_v53 = vsel %vm709_vm0, %v695_v21, %v696_v23  ;;  %v3784_v49 = vadd.f32 %v1409_v14, %v1376_v41  ;;  %v4743_v23 = vld [vmem:[#allocation51_spill] sm:$0xff] }
  0xed   : > { %v1625_v48 = vmul.f32 %v3635_v13, %v1168_v42  ;;  %v3786_v59 = vadd.f32 %v1571_v25, %v1538_v43  ;;  %v3788_v60 = vadd.f32 %v1572_v2, %v1539_v45  ;;  %v4742_v54 = vrot.slane %v4741_v36, 7  ;;  %v4745_v2 = vld [vmem:[#allocation55_spill] sm:$0xff]  ;;  %v4747_v25 = vld [vmem:[#allocation57_spill] sm:$0xff]  ;;  %v2192_v36 = vpop.permute.xlu1 %2191 }
  0xee   : > { %4740 = vst [vmem:[#allocation90_spill] sm:$0xff] %v3784_v49  ;;  %v1299_v40 = vmul.f32 %v3629_v5, %v1168_v42  ;;  %v1462_v30 = vmul.f32 %v3632_v12, %v1168_v42  ;;  %v1243_v41 = vmul.f32 %v2947_v33, %v3758_v6  ;;  %v3799_v43 = vadd.f32 %v1298_v39, %v4743_v23 }
  0xef   : > { %v723_v44 = vsel %vm709_vm0, %v4742_v54, %v695_v21  ;;  %v3802_v14 = vadd.f32 %v1461_v38, %v4745_v2  ;;  %v1656_v45 = vadd.f32 %v1624_v55, %v4747_v25  ;;  %v921_v32 = vmul.f32 %v2174_v19, %v722_v53  ;;  %v4748_v21 = vld [vmem:[#allocation58_spill] sm:$0xff] }
  0xf0   : > { %v920_v63 = vmul.f32 %v2173_v3, %v723_v44  ;;  %4744 = vst [vmem:[#allocation24_spill] sm:$0xff] %v3799_v43  ;;  %v1657_v16 = vadd.f32 %v1625_v48, %v4748_v21  ;;  %v1244_v3 = vmul.f32 %v2947_v33, %v3696_v9  ;;  %v1406_v42 = vmul.f32 %v4720_v26, %v3758_v6  ;;  %v3817_v55 = vld [vmem:[%s2610_s5 + $0xc8] sm:$0xff]  ;;  %v3820_v48 = vld [vmem:[%s2610_s5 + $0xd0] sm:$0xff]  ;;  %v4753_v43 = vld [vmem:[#allocation56_spill] sm:$0xff] }
  0xf1   : > { %4746 = vst [vmem:[#allocation51_spill] sm:$0xff] %v3802_v14  ;;  %v1211_v39 = vmul.f32 %v2944_v24, %v921_v32  ;;  %v1374_v38 = vmul.f32 %v2978_v4, %v921_v32  ;;  %v1407_v19 = vmul.f32 %v4720_v26, %v3696_v9  ;;  %v1537_v44 = vmul.f32 %v2988_v20, %v921_v32  ;;  %v4751_v25 = vld [vmem:[#allocation54_spill] sm:$0xff] }
  0xf2   : > { %v1210_v35 = vmul.f32 %v2944_v24, %v920_v63  ;;  %v1373_v54 = vmul.f32 %v2978_v4, %v920_v63  ;;  %4749 = vst [vmem:[#allocation55_spill] sm:$0xff] %v3817_v55  ;;  %v1536_v53 = vmul.f32 %v2988_v20, %v920_v63  ;;  %v1569_v23 = vmul.f32 %v4724_v17, %v3758_v6 }
  0xf3   : > { %4750 = vst [vmem:[#allocation57_spill] sm:$0xff] %v3820_v48  ;;  %v1570_v2 = vmul.f32 %v4724_v17, %v3696_v9  ;;  %v3829_v21 = vadd.f32 %v1299_v40, %v4751_v25  ;;  %v3832_v14 = vadd.f32 %v1462_v30, %v4753_v43  ;;  %v2194_v46 = vunpack.i.h.bf16 %v2192_v36 }
  0xf4   : > { %v2193_v62 = vunpack.i.l.bf16 %v2192_v36  ;;  %v3835_v31 = vadd.f32 %v3691_v10, %v1656_v45  ;;  %v3838_v63 = vadd.f32 %v3691_v10, %v1657_v16  ;;  %v702_v32 = vrot.slane %v3817_v55, 7  ;;  %v4763_v36 = vld [vmem:[#allocation46_spill] sm:$0xff] }
  0xf5   : > { %4752 = vst [vmem:[#allocation58_spill] sm:$0xff] %v3829_v21  ;;  %v703_v6 = vrot.slane %v3820_v48, 7  ;;  %v3842_v9 = vadd.f32 %v1243_v41, %v1210_v35  ;;  %v3844_v40 = vadd.f32 %v1244_v3, %v1211_v39  ;;  %v3846_v25 = vadd.f32 %v1406_v42, %v1373_v54  ;;  %v4765_v54 = vld [vmem:[#allocation67_spill] sm:$0xff] }
  0xf6   : > { %4754 = vst [vmem:[#allocation54_spill] sm:$0xff] %v3832_v14  ;;  %v3848_v30 = vadd.f32 %v1407_v19, %v1374_v38  ;;  %v3850_v43 = vadd.f32 %v1569_v23, %v1536_v53  ;;  %v3852_v45 = vadd.f32 %v1570_v2, %v1537_v44  ;;  %v4764_v16 = vrot.slane %v4763_v36, 7  ;;  %v4766_v19 = vld [vmem:[#allocation26_spill] sm:$0xff]  ;;  %v4767_v44 = vld [vmem:[#allocation23_spill] sm:$0xff]  ;;  %v2187_v2 = vpop.permute.xlu0 %2186 }
  0xf7   : > { %4755 = vst [vmem:[#allocation56_spill] sm:$0xff] %v3835_v31  ;;  %v715_v14 = vsel %vm709_vm0, %v702_v32, %v703_v6  ;;  %v1251_v3 = vmul.f32 %v2947_v33, %v3820_v48  ;;  %v2244_v42 = vunpack.i.h.bf16 %v2242_v34  ;;  %v2243_v39 = vunpack.i.l.bf16 %v2242_v34 }
  0xf8   : > { %4756 = vst [vmem:[#allocation91_spill] sm:$0xff] %v3838_v63  ;;  %v714_v21 = vsel %vm709_vm0, %v703_v6, %v4764_v16  ;;  %v928_v41 = vmul.f32 %v2193_v62, %v715_v14  ;;  %v4574_v38 = vrot.slane %v4765_v54, 1  ;;  %v949_v53 = vrot.slane %v4766_v19, 1  ;;  %v3884_v19 = vld [vmem:[%s2610_s5 + $0xc0] sm:$0xff] }
  0xf9   : > { %4757 = vst [vmem:[#allocation92_spill] sm:$0xff] %v3842_v9  ;;  %v929_v35 = vmul.f32 %v2194_v46, %v714_v21  ;;  %v4572_v23 = vrot.slane %v4767_v44, 1  ;;  %v1252_v62 = vmul.f32 %v2947_v33, %v4763_v36  ;;  %v1414_v46 = vmul.f32 %v4720_v26, %v3820_v48 }
  0xfa   : > { %4758 = vst [vmem:[#allocation93_spill] sm:$0xff] %v3844_v40  ;;  %v1218_v16 = vmul.f32 %v2944_v24, %v928_v41  ;;  %v1415_v34 = vmul.f32 %v4720_v26, %v4763_v36  ;;  %v1577_v6 = vmul.f32 %v4724_v17, %v3820_v48  ;;  %v983_v21 = vsel %vm966_vm1, %v4574_v38, %v949_v53 }
  0xfb   : > { %4759 = vst [vmem:[#allocation94_spill] sm:$0xff] %v3846_v25  ;;  %v982_v14 = vsel %vm966_vm1, %v949_v53, %v4572_v23  ;;  %v1381_v25 = vmul.f32 %v2978_v4, %v928_v41  ;;  %v2189_v40 = vunpack.i.h.bf16 %v2187_v2  ;;  %v1544_v44 = vmul.f32 %v2988_v20, %v928_v41 }
  0xfc   : > { %4760 = vst [vmem:[#allocation95_spill] sm:$0xff] %v3848_v30  ;;  %v1219_v30 = vmul.f32 %v2944_v24, %v929_v35  ;;  %v1545_v9 = vmul.f32 %v2988_v20, %v929_v35  ;;  %v1173_v23 = vmul.f32 %v2243_v39, %v983_v21  ;;  %v1174_v63 = vmul.f32 %v2244_v42, %v982_v14 }
  0xfd   : > { %4761 = vst [vmem:[#allocation96_spill] sm:$0xff] %v3850_v43  ;;  %v1578_v43 = vmul.f32 %v4724_v17, %v4763_v36  ;;  %v3892_v31 = vadd.f32 %v1251_v3, %v1218_v16  ;;  %v2188_v53 = vunpack.i.l.bf16 %v2187_v2  ;;  %v701_v38 = vrot.slane %v3884_v19, 7 }
  0xfe   : > { %4762 = vst [vmem:[#allocation97_spill] sm:$0xff] %v3852_v45  ;;  %v1382_v45 = vmul.f32 %v2978_v4, %v929_v35  ;;  %v3894_v54 = vadd.f32 %v1252_v62, %v1219_v30  ;;  %v1304_v48 = vmul.f32 %v3629_v5, %v1173_v23  ;;  %v1305_v22 = vmul.f32 %v3629_v5, %v1174_v63  ;;  %v4770_v30 = vld [vmem:[#allocation30_spill] sm:$0xff] }
  0xff   : > { %4768 = vst [vmem:[#allocation26_spill] sm:$0xff] %v3892_v31  ;;  %v1467_v36 = vmul.f32 %v3632_v12, %v1173_v23  ;;  %v1468_v49 = vmul.f32 %v3632_v12, %v1174_v63  ;;  %v1630_v41 = vmul.f32 %v3635_v13, %v1173_v23  ;;  %v1631_v35 = vmul.f32 %v3635_v13, %v1174_v63  ;;  %v4775_v31 = vld [vmem:[#allocation33_spill] sm:$0xff] }
 0x100   : > { %4769 = vst [vmem:[#allocation98_spill] sm:$0xff] %v3894_v54  ;;  %v716_v3 = vsel %vm709_vm0, %v701_v38, %v702_v32  ;;  %v4771_v42 = vrot.slane %v4770_v30, 7  ;;  %v3909_v2 = vadd.f32 %v1414_v46, %v1381_v25  ;;  %v3911_v16 = vadd.f32 %v1415_v34, %v1382_v45 }
 0x101   : > { %v3913_v62 = vadd.f32 %v1577_v6, %v1544_v44  ;;  %v3915_v14 = vadd.f32 %v1578_v43, %v1545_v9  ;;  %v1662_v23 = vadd.f32 %v1630_v41, %v3673_v28  ;;  %v1663_v63 = vadd.f32 %v1631_v35, %v3676_v57 }
 0x102   : > { %v717_v39 = vsel %vm709_vm0, %v4771_v42, %v701_v38  ;;  %v927_v54 = vmul.f32 %v2189_v40, %v716_v3  ;;  %v3920_v32 = vadd.f32 %v1304_v48, %v3647_v8  ;;  %v3923_v30 = vadd.f32 %v1305_v22, %v3650_v52  ;;  %v2257_v52 = vpop.permute.xlu2 %2256  ;;  %v4774_v3 = vld [vmem:[#allocation29_spill] sm:$0xff] }
 0x103   : > { %v926_v21 = vmul.f32 %v2188_v53, %v717_v39  ;;  %v1249_v25 = vmul.f32 %v2947_v33, %v3884_v19  ;;  %v1250_v45 = vmul.f32 %v2947_v33, %v3817_v55  ;;  %v3930_v9 = vadd.f32 %v1467_v36, %v3653_v47  ;;  %v3956_v53 = vld [vmem:[%s2610_s5 + $0xf0] sm:$0xff] }
 0x104   : > { %4772 = vst [vmem:[#allocation30_spill] sm:$0xff] %v3920_v32  ;;  %v3933_v28 = vadd.f32 %v1468_v49, %v3656_v56  ;;  %v1412_v57 = vmul.f32 %v4720_v26, %v3884_v19  ;;  %v1413_v8 = vmul.f32 %v4720_v26, %v3817_v55  ;;  %v3940_v22 = vadd.f32 %v3691_v10, %v1662_v23  ;;  %v2207_v49 = vpop.permute.xlu1 %2206  ;;  %v4776_v32 = vld [vmem:[#allocation34_spill] sm:$0xff] }
 0x105   : > { %4773 = vst [vmem:[#allocation99_spill] sm:$0xff] %v3923_v30  ;;  %v1216_v48 = vmul.f32 %v2944_v24, %v926_v21  ;;  %v1575_v47 = vmul.f32 %v4724_v17, %v3884_v19  ;;  %v1576_v56 = vmul.f32 %v4724_v17, %v3817_v55  ;;  %v3948_v40 = vadd.f32 %v3691_v10, %v1663_v63 }
 0x106   : > { %v1217_v43 = vmul.f32 %v2944_v24, %v927_v54  ;;  %v1379_v36 = vmul.f32 %v2978_v4, %v926_v21  ;;  %v1380_v38 = vmul.f32 %v2978_v4, %v927_v54  ;;  %v1542_v44 = vmul.f32 %v2988_v20, %v926_v21 }
 0x107   : > { %v1543_v46 = vmul.f32 %v2988_v20, %v927_v54  ;;  %v2259_v34 = vunpack.i.h.bf16 %v2257_v52  ;;  %v2258_v6 = vunpack.i.l.bf16 %v2257_v52  ;;  %v4581_v41 = vrot.slane %v3699_v50, 1  ;;  %v2202_v52 = vpop.permute.xlu0 %2201 }
 0x108   : > { %v955_v35 = vrot.slane %v4731_v29, 1  ;;  %v4579_v42 = vrot.slane %v4774_v3, 1  ;;  %v2209_v39 = vunpack.i.h.bf16 %v2207_v49  ;;  %v3961_v23 = vadd.f32 %v1249_v25, %v1216_v48 }
 0x109   : > { %v2208_v63 = vunpack.i.l.bf16 %v2207_v49  ;;  %v935_v21 = vrot.slane %v4776_v32, 1  ;;  %v3965_v55 = vadd.f32 %v1250_v45, %v1217_v43  ;;  %v707_v25 = vrot.slane %v3956_v53, 7 }
 0x10a   : > { %v976_v54 = vsel %vm966_vm1, %v955_v35, %v4579_v42  ;;  %v977_v29 = vsel %vm966_vm1, %v4581_v41, %v955_v35  ;;  %v4778_v30 = vrot.slane %v4708_v7, 1  ;;  %v4779_v45 = vrot.slane %v4775_v31, 1 }
 0x10b   : > { %4777 = vst [vmem:[#allocation34_spill] sm:$0xff] %v3965_v55  ;;  %v1179_v48 = vmul.f32 %v2258_v6, %v977_v29  ;;  %v1180_v49 = vmul.f32 %v2259_v34, %v976_v54  ;;  %v3984_v42 = vadd.f32 %v1412_v57, %v1379_v36  ;;  %v3986_v3 = vadd.f32 %v1413_v8, %v1380_v38  ;;  %v4780_v38 = vld [vmem:[#allocation35_spill] sm:$0xff] }
 0x10c   : > { %v996_v32 = vsel %vm966_vm1, %v935_v21, %v4778_v30  ;;  %v997_v43 = vsel %vm966_vm1, %v4779_v45, %v935_v21  ;;  %v3988_v55 = vadd.f32 %v1575_v47, %v1542_v44  ;;  %v2204_v6 = vunpack.i.h.bf16 %v2202_v52  ;;  %v4782_v44 = vld [vmem:[#allocation50_spill] sm:$0xff] }
 0x10d   : > { %v1159_v35 = vmul.f32 %v2208_v63, %v997_v43  ;;  %v1160_v41 = vmul.f32 %v2209_v39, %v996_v32  ;;  %v1310_v34 = vmul.f32 %v3629_v5, %v1179_v48  ;;  %v1311_v7 = vmul.f32 %v3629_v5, %v1180_v49 }
 0x10e   : > { %v1636_v30 = vmul.f32 %v3635_v13, %v1179_v48  ;;  %v1637_v54 = vmul.f32 %v3635_v13, %v1180_v49  ;;  %v1473_v8 = vmul.f32 %v3632_v12, %v1179_v48  ;;  %v2203_v36 = vunpack.i.l.bf16 %v2202_v52 }
 0x10f   : > { %v1290_v29 = vmul.f32 %v3629_v5, %v1159_v35  ;;  %v1291_v57 = vmul.f32 %v3629_v5, %v1160_v41  ;;  %v4781_v39 = vrot.slane %v4780_v38, 7  ;;  %v4783_v63 = vrot.slane %v4782_v44, 7 }
 0x110   : > { %v1474_v32 = vmul.f32 %v3632_v12, %v1180_v49  ;;  %v1668_v45 = vadd.f32 %v1636_v30, %v3786_v59  ;;  %v1669_v43 = vadd.f32 %v1637_v54, %v3788_v60  ;;  %v1453_v52 = vmul.f32 %v3632_v12, %v1159_v35 }
 0x111   : > { %v710_v47 = vsel %vm709_vm0, %v707_v25, %v4781_v39  ;;  %v711_v21 = vsel %vm709_vm0, %v4783_v63, %v707_v25  ;;  %v1322_v31 = vadd.f32 %v1290_v29, %v3532_v51  ;;  %v1454_v48 = vmul.f32 %v3632_v12, %v1160_v41  ;;  %v4051_v29 = vld [vmem:[%s2610_s5 + $0xf8] sm:$0xff] }
 0x112   : > { %v1616_v38 = vmul.f32 %v3635_v13, %v1159_v35  ;;  %v1617_v39 = vmul.f32 %v3635_v13, %v1160_v41  ;;  %v4013_v44 = vadd.f32 %v1576_v56, %v1543_v46  ;;  %v4016_v25 = vadd.f32 %v1310_v34, %v3771_v0  ;;  %v4786_v46 = vld [vmem:[#allocation90_spill] sm:$0xff] }
 0x113   : > { %v4019_v49 = vadd.f32 %v1311_v7, %v3777_v1  ;;  %v1323_v59 = vadd.f32 %v1291_v57, %v3535_v11  ;;  %v1485_v51 = vadd.f32 %v1453_v52, %v3544_v37  ;;  %v1486_v60 = vadd.f32 %v1454_v48, %v3547_v18  ;;  %v4787_v37 = vld [vmem:[#allocation22_spill] sm:$0xff]  ;;  %v4789_v7 = vld [vmem:[#allocation21_spill] sm:$0xff] }
 0x114   : > { %4784 = vst [vmem:[#allocation35_spill] sm:$0xff] %v4016_v25  ;;  %v1648_v30 = vadd.f32 %v1616_v38, %v3550_v61  ;;  %v1649_v35 = vadd.f32 %v1617_v39, %v3553_v27  ;;  %v4027_v56 = vadd.f32 %v1473_v8, %v3779_v58  ;;  %v4030_v0 = vadd.f32 %v1474_v32, %v4786_v46  ;;  %v2222_v27 = vpop.permute.xlu1 %2221  ;;  %v2272_v8 = vpop.permute.xlu2 %2271  ;;  %v4826_v25 = vld [vmem:[#allocation42_spill] sm:$0xff] }
 0x115   : > { %4785 = vst [vmem:[#allocation50_spill] sm:$0xff] %v4019_v49  ;;  %v932_v41 = vmul.f32 %v2203_v36, %v711_v21  ;;  %v933_v1 = vmul.f32 %v2204_v6, %v710_v47  ;;  %v4033_v34 = vadd.f32 %v3691_v10, %v1668_v45  ;;  %v4036_v11 = vadd.f32 %v3691_v10, %v1669_v43 }
 0x116   : > { %v4039_v18 = vadd.f32 %v4787_v37, %v1322_v31  ;;  %v1255_v61 = vmul.f32 %v2947_v33, %v3956_v53  ;;  %v4044_v58 = vadd.f32 %v3691_v10, %v1648_v30  ;;  %v4047_v54 = vadd.f32 %v4789_v7, %v1323_v59  ;;  %v4793_v59 = vld [vmem:[#allocation57_spill] sm:$0xff]  ;;  %v2287_v7 = vld [vmem:[%s2610_s5 + $0x38] sm:$0xff] }
 0x117   : > { %v1222_v6 = vmul.f32 %v2944_v24, %v932_v41  ;;  %v1256_v57 = vmul.f32 %v4051_v29, %v2947_v33  ;;  %v4056_v31 = vadd.f32 %v3691_v10, %v1649_v35  ;;  %v4058_v36 = vmul.f32 0.0, %v1485_v51  ;;  %v4794_v51 = vld [vmem:[#allocation46_spill] sm:$0xff]  ;;  %v4796_v37 = vld [vmem:[#allocation53_spill] sm:$0xff] }
 0x118   : > { %4788 = vst [vmem:[#allocation90_spill] sm:$0xff] %v4044_v58  ;;  %v4060_v47 = vmul.f32 0.0, %v1486_v60  ;;  %v1223_v63 = vmul.f32 %v2944_v24, %v933_v1  ;;  %v1385_v21 = vmul.f32 %v2978_v4, %v932_v41  ;;  %v1386_v32 = vmul.f32 %v2978_v4, %v933_v1 }
 0x119   : > { %4790 = vst [vmem:[#allocation22_spill] sm:$0xff] %v4056_v31  ;;  %v1418_v45 = vmul.f32 %v4720_v26, %v3956_v53  ;;  %v1419_v33 = vmul.f32 %v4051_v29, %v4720_v26  ;;  %v4069_v43 = vadd.f32 %v1255_v61, %v1222_v6  ;;  %v1548_v52 = vmul.f32 %v2988_v20, %v932_v41  ;;  %v4795_v26 = vld [vmem:[#allocation47_spill] sm:$0xff] }
 0x11a   : > { %4791 = vst [vmem:[#allocation21_spill] sm:$0xff] %v4058_v36  ;;  %v1549_v48 = vmul.f32 %v2988_v20, %v933_v1  ;;  %v2273_v38 = vunpack.i.l.bf16 %v2272_v8  ;;  %v1581_v24 = vmul.f32 %v4724_v17, %v3956_v53  ;;  %v2274_v39 = vunpack.i.h.bf16 %v2272_v8  ;;  %v4800_v36 = vld [vmem:[#allocation16_spill] sm:$0xff] }
 0x11b   : > { %4792 = vst [vmem:[#allocation100_spill] sm:$0xff] %v4060_v47  ;;  %v4583_v4 = vrot.slane %v4793_v59, 1  ;;  %v961_v60 = vrot.slane %v4794_v51, 1  ;;  %v1582_v30 = vmul.f32 %v4051_v29, %v4724_v17  ;;  %v4584_v35 = vrot.slane %v4795_v26, 1 }
 0x11c   : > { %v2223_v46 = vunpack.i.l.bf16 %v2222_v27  ;;  %v940_v61 = vrot.slane %v4796_v37, 1  ;;  %v4081_v41 = vadd.f32 %v1256_v57, %v1223_v63  ;;  %v2224_v1 = vunpack.i.h.bf16 %v2222_v27  ;;  %v2217_v57 = vpop.permute.xlu0 %2216 }
 0x11d   : > { %v971_v20 = vsel %vm966_vm1, %v4583_v4, %v961_v60  ;;  %v941_v6 = vrot.slane %v2287_v7, 1  ;;  %v4088_v8 = vadd.f32 %v1418_v45, %v1385_v21  ;;  %v4090_v51 = vadd.f32 %v1419_v33, %v1386_v32 }
 0x11e   : > { %v970_v17 = vsel %vm966_vm1, %v961_v60, %v4584_v35  ;;  %v1185_v37 = vmul.f32 %v2273_v38, %v971_v20  ;;  %v4096_v63 = vadd.f32 %v1581_v24, %v1548_v52  ;;  %v4801_v4 = vrot.slane %v4800_v36, 1  ;;  %v2237_v60 = vpop.permute.xlu1 %2236 }
 0x11f   : > { %4797 = vst [vmem:[#allocation57_spill] sm:$0xff] %v4088_v8  ;;  %v1186_v47 = vmul.f32 %v2274_v39, %v970_v17  ;;  %v991_v21 = vsel %vm966_vm1, %v940_v61, %v941_v6  ;;  %v4104_v32 = vadd.f32 %v1582_v30, %v1549_v48  ;;  %v2219_v36 = vunpack.i.h.bf16 %v2217_v57  ;;  %v4812_v8 = vld [vmem:[#allocation86_spill] sm:$0xff] }
 0x120   : > { %4798 = vst [vmem:[#allocation46_spill] sm:$0xff] %v4090_v51  ;;  %v990_v27 = vsel %vm966_vm1, %v941_v6, %v4801_v4  ;;  %v1479_v45 = vmul.f32 %v3632_v12, %v1185_v37  ;;  %v1642_v33 = vmul.f32 %v3635_v13, %v1185_v37  ;;  %v1165_v38 = vmul.f32 %v2223_v46, %v991_v21  ;;  %v2288_v6 = vld [vmem:[%s2610_s5 + $0x28] sm:$0xff] }
 0x121   : > { %4799 = vst [vmem:[#allocation47_spill] sm:$0xff] %v4096_v63  ;;  %v1480_v52 = vmul.f32 %v3632_v12, %v1186_v47  ;;  %v1643_v24 = vmul.f32 %v3635_v13, %v1186_v47  ;;  %v1166_v39 = vmul.f32 %v2224_v1, %v990_v27  ;;  %v2218_v7 = vunpack.i.l.bf16 %v2217_v57 }
 0x122   : > { %4802 = vst [vmem:[#allocation53_spill] sm:$0xff] %v4104_v32  ;;  %v1674_v20 = vadd.f32 %v1642_v33, %v3913_v62  ;;  %v1296_v4 = vmul.f32 %v3629_v5, %v1165_v38  ;;  %v939_v48 = vrot.slane %v2288_v6, 1  ;;  %v2239_v35 = vunpack.i.h.bf16 %v2237_v60  ;;  %v4816_v32 = vld [vmem:[#allocation66_spill] sm:$0xff] }
 0x123   : > { %v1675_v30 = vadd.f32 %v1643_v24, %v3915_v14  ;;  %v1297_v17 = vmul.f32 %v3629_v5, %v1166_v39  ;;  %v2238_v46 = vunpack.i.l.bf16 %v2237_v60  ;;  %v4116_v21 = vmul.f32 %v3629_v5, %v1185_v37  ;;  %v4809_v60 = vld [vmem:[#allocation81_spill] sm:$0xff] }
 0x124   : > { %v4119_v51 = vmul.f32 %v3629_v5, %v1186_v47  ;;  %v4122_v1 = vadd.f32 %v1479_v45, %v3909_v2  ;;  %v4125_v62 = vadd.f32 %v1480_v52, %v3911_v16  ;;  %v1459_v57 = vmul.f32 %v3632_v12, %v1165_v38  ;;  %v4810_v45 = vld [vmem:[#allocation82_spill] sm:$0xff]  ;;  %v4811_v24 = vld [vmem:[#allocation85_spill] sm:$0xff] }
 0x125   : > { %4803 = vst [vmem:[#allocation16_spill] sm:$0xff] %v4116_v21  ;;  %v1460_v14 = vmul.f32 %v3632_v12, %v1166_v39  ;;  %v1622_v27 = vmul.f32 %v3635_v13, %v1165_v38  ;;  %v1623_v33 = vmul.f32 %v3635_v13, %v1166_v39  ;;  %v4132_v37 = vadd.f32 %v3691_v10, %v1674_v20  ;;  %v4813_v38 = vld [vmem:[#allocation31_spill] sm:$0xff] }
 0x126   : > { %4804 = vst [vmem:[#allocation101_spill] sm:$0xff] %v4119_v51  ;;  %v4135_v47 = vadd.f32 %v3691_v10, %v1675_v30  ;;  %v1328_v2 = vadd.f32 %v1296_v4, %v4809_v60  ;;  %v992_v16 = vsel %vm966_vm1, %v939_v48, %v940_v61  ;;  %v1329_v52 = vadd.f32 %v1297_v17, %v4810_v45  ;;  %v4815_v30 = vld [vmem:[#allocation68_spill] sm:$0xff]  ;;  %v4817_v60 = vld [vmem:[#allocation83_spill] sm:$0xff] }
 0x127   : > { %4805 = vst [vmem:[#allocation102_spill] sm:$0xff] %v4122_v1  ;;  %v1654_v6 = vadd.f32 %v1622_v27, %v4811_v24  ;;  %v1655_v51 = vadd.f32 %v1623_v33, %v4812_v8  ;;  %v4814_v21 = vrot.slane %v4813_v38, 1  ;;  %v1164_v31 = vmul.f32 %v2219_v36, %v992_v16  ;;  %v4818_v61 = vld [vmem:[#allocation84_spill] sm:$0xff]  ;;  %v4821_v16 = vld [vmem:[#allocation37_spill] sm:$0xff]  ;;  %v4822_v24 = vld [vmem:[#allocation38_spill] sm:$0xff] }
 0x128   : > { %4806 = vst [vmem:[#allocation103_spill] sm:$0xff] %v4125_v62  ;;  %v946_v58 = vrot.slane %v4815_v30, 1  ;;  %v947_v4 = vrot.slane %v4816_v32, 1  ;;  %v1491_v63 = vadd.f32 %v1459_v57, %v4817_v60  ;;  %v1492_v49 = vadd.f32 %v1460_v14, %v4818_v61  ;;  %v4823_v38 = vld [vmem:[#allocation39_spill] sm:$0xff]  ;;  %v4824_v60 = vld [vmem:[#allocation40_spill] sm:$0xff]  ;;  %v4825_v61 = vld [vmem:[#allocation41_spill] sm:$0xff] }
 0x129   : > { %4807 = vst [vmem:[#allocation104_spill] sm:$0xff] %v4132_v37  ;;  %v993_v39 = vsel %vm966_vm1, %v4814_v21, %v939_v48  ;;  %v1689_v17 = vadd.f32 %v3691_v10, %v1654_v6  ;;  %v1690_v27 = vadd.f32 %v3691_v10, %v1655_v51  ;;  %v1295_v33 = vmul.f32 %v3629_v5, %v1164_v31  ;;  %v4819_v21 = vld [vmem:[#allocation67_spill] sm:$0xff]  ;;  %v2232_v37 = vpop.permute.xlu0 %2231 }
 0x12a   : > { %4808 = vst [vmem:[#allocation105_spill] sm:$0xff] %v4135_v47  ;;  %v1163_v20 = vmul.f32 %v2218_v7, %v993_v39  ;;  %v1458_v36 = vmul.f32 %v3632_v12, %v1164_v31  ;;  %v1621_v32 = vmul.f32 %v3635_v13, %v1164_v31  ;;  %v4820_v57 = vrot.slane %v4819_v21, 1 }
 0x12b   : > { %v985_v51 = vsel %vm966_vm1, %v946_v58, %v947_v4  ;;  %v1327_v6 = vadd.f32 %v1295_v33, %v4822_v24 }
 0x12c   : > { %v1294_v8 = vmul.f32 %v3629_v5, %v1163_v20  ;;  %v1457_v48 = vmul.f32 %v3632_v12, %v1163_v20  ;;  %v1620_v7 = vmul.f32 %v3635_v13, %v1163_v20  ;;  %v984_v14 = vsel %vm966_vm1, %v947_v4, %v4820_v57 }
 0x12d   : > { %v1490_v20 = vadd.f32 %v1458_v36, %v4824_v60  ;;  %v1653_v21 = vadd.f32 %v1621_v32, %v4826_v25  ;;  %v1171_v47 = vmul.f32 %v2238_v46, %v985_v51  ;;  %v1172_v57 = vmul.f32 %v2239_v35, %v984_v14  ;;  %v4828_v46 = vld [vmem:[#allocation91_spill] sm:$0xff]  ;;  %v4830_v32 = vld [vmem:[#allocation54_spill] sm:$0xff] }
 0x12e   : > { %v1326_v45 = vadd.f32 %v1294_v8, %v4821_v16  ;;  %v1489_v39 = vadd.f32 %v1457_v48, %v4823_v38  ;;  %v1652_v31 = vadd.f32 %v1620_v7, %v4825_v61  ;;  %v1754_v1 = vadd.f32 %v1690_v27, %v1327_v6  ;;  %v4827_v16 = vld [vmem:[#allocation56_spill] sm:$0xff]  ;;  %v4832_v51 = vld [vmem:[#allocation59_spill] sm:$0xff] }
 0x12f   : > { %v1814_v8 = vadd.f32 %v4047_v54, %v1490_v20  ;;  %v1688_v48 = vadd.f32 %v3691_v10, %v1653_v21  ;;  %v1302_v36 = vmul.f32 %v3629_v5, %v1171_v47  ;;  %v1303_v7 = vmul.f32 %v3629_v5, %v1172_v57  ;;  %v4831_v54 = vld [vmem:[#allocation71_spill] sm:$0xff] }
 0x130   : > { %v1753_v62 = vadd.f32 %v1689_v17, %v1326_v45  ;;  %v1813_v4 = vadd.f32 %v4039_v18, %v1489_v39  ;;  %v1687_v33 = vadd.f32 %v3691_v10, %v1652_v31  ;;  %v4180_v25 = vadd.f32 %v4827_v16, %v1328_v2  ;;  %v4829_v17 = vld [vmem:[#allocation51_spill] sm:$0xff]  ;;  %v2289_v16 = vld [vmem:[%s2610_s5 + $0x58] sm:$0xff] }
 0x131   : > { %v4183_v35 = vadd.f32 %v4828_v46, %v1329_v52  ;;  %v1818_v18 = vadd.f32 %v1754_v1, %v4830_v32  ;;  %v1752_v2 = vadd.f32 %v1688_v48, %v4832_v51  ;;  %1846 = vst [vmem:[%s4189_s9 + $0x18] sm:$0xff] %v1814_v8  ;;  %v1465_v52 = vmul.f32 %v3632_v12, %v1171_v47  ;;  %v4833_v1 = vld [vmem:[#allocation25_spill] sm:$0xff]  ;;  %v4834_v61 = vld [vmem:[#allocation27_spill] sm:$0xff] }
 0x132   : > { %v1817_v27 = vadd.f32 %v1753_v62, %v4829_v17  ;;  %1845 = vst [vmem:[%s4189_s9 + $0x10] sm:$0xff] %v1813_v4  ;;  %v1751_v14 = vadd.f32 %v1687_v33, %v4831_v54  ;;  %v2234_v45 = vunpack.i.h.bf16 %v2232_v37  ;;  %v2252_v62 = vpop.permute.xlu1 %2251  ;;  %v1334_v24 = vadd.f32 %v1302_v36, %v4833_v1  ;;  %v4835_v4 = vld [vmem:[#allocation28_spill] sm:$0xff]  ;;  %v4836_v33 = vld [vmem:[#allocation89_spill] sm:$0xff]  ;;  %v4837_v17 = vld [vmem:[#allocation87_spill] sm:$0xff] }
 0x133   : > { %v1466_v6 = vmul.f32 %v3632_v12, %v1172_v57  ;;  %v1628_v38 = vmul.f32 %v3635_v13, %v1171_v47  ;;  %v1629_v39 = vmul.f32 %v3635_v13, %v1172_v57  ;;  %v1816_v20 = vadd.f32 %v1752_v2, %v1492_v49  ;;  %1850 = vst [vmem:[%s4189_s9 + $0x38] sm:$0xff] %v1818_v18  ;;  %v4838_v32 = vld [vmem:[#allocation17_spill] sm:$0xff]  ;;  %v4839_v54 = vld [vmem:[#allocation32_spill] sm:$0xff] }
 0x134   : > { %1849 = vst [vmem:[%s4189_s9 + $0x30] sm:$0xff] %v1817_v27  ;;  %v1815_v60 = vadd.f32 %v1751_v14, %v1491_v63  ;;  %v1335_v31 = vadd.f32 %v1303_v7, %v4834_v61  ;;  %v2233_v21 = vunpack.i.l.bf16 %v2232_v37  ;;  %v945_v46 = vrot.slane %v2289_v16, 1  ;;  %v4840_v49 = vld [vmem:[#allocation88_spill] sm:$0xff]  ;;  %v4845_v16 = vld [vmem:[#allocation61_spill] sm:$0xff] }
 0x135   : > { %v1660_v8 = vadd.f32 %v1628_v38, %v4835_v4  ;;  %v1661_v48 = vadd.f32 %v1629_v39, %v4836_v33  ;;  %v2254_v36 = vunpack.i.h.bf16 %v2252_v62  ;;  %v1497_v27 = vadd.f32 %v1465_v52, %v4837_v17  ;;  %1848 = vst [vmem:[%s4189_s9 + $0x28] sm:$0xff] %v1816_v20  ;;  %v4841_v14 = vld [vmem:[#allocation20_spill] sm:$0xff] }
 0x136   : > { %1847 = vst [vmem:[%s4189_s9 + $0x20] sm:$0xff] %v1815_v60  ;;  %v2253_v47 = vunpack.i.l.bf16 %v2252_v62  ;;  %v952_v57 = vrot.slane %v4838_v32, 1  ;;  %v953_v63 = vrot.slane %v4839_v54, 1  ;;  %v1498_v18 = vadd.f32 %v1466_v6, %v4840_v49  ;;  %v4844_v33 = vld [vmem:[#allocation60_spill] sm:$0xff]  ;;  %v4849_v49 = vld [vmem:[#allocation65_spill] sm:$0xff] }
 0x137   : > { %v4213_v37 = vadd.f32 %v3940_v22, %v1334_v24  ;;  %v986_v7 = vsel %vm966_vm1, %v945_v46, %v946_v58  ;;  %v4842_v51 = vrot.slane %v4841_v14, 1  ;;  %v4843_v1 = vrot.slane %v3699_v50, 1  ;;  %v2247_v24 = vpop.permute.xlu0 %2246  ;;  %v4848_v54 = vld [vmem:[#allocation64_spill] sm:$0xff] }
 0x138   : > { %v1170_v62 = vmul.f32 %v2234_v45, %v986_v7  ;;  %v979_v22 = vsel %vm966_vm1, %v952_v57, %v953_v63  ;;  %v1695_v30 = vadd.f32 %v3691_v10, %v1660_v8  ;;  %v1696_v58 = vadd.f32 %v3691_v10, %v1661_v48 }
 0x139   : > { %v987_v2 = vsel %vm966_vm1, %v4842_v51, %v945_v46  ;;  %v978_v6 = vsel %vm966_vm1, %v953_v63, %v4843_v1  ;;  %v1177_v38 = vmul.f32 %v2253_v47, %v979_v22  ;;  %v4236_v61 = vadd.f32 %v3948_v40, %v1335_v31  ;;  %v4847_v47 = vld [vmem:[#allocation63_spill] sm:$0xff]  ;;  %v2290_v22 = vld [vmem:[%s2610_s5 + $0x88] sm:$0xff] }
 0x13a   : > { %v1169_v52 = vmul.f32 %v2233_v21, %v987_v2  ;;  %v1178_v39 = vmul.f32 %v2254_v36, %v978_v6  ;;  %v1301_v20 = vmul.f32 %v3629_v5, %v1170_v62  ;;  %v1464_v50 = vmul.f32 %v3632_v12, %v1170_v62  ;;  %v4846_v36 = vld [vmem:[#allocation62_spill] sm:$0xff] }
 0x13b   : > { %v1627_v4 = vmul.f32 %v3635_v13, %v1170_v62  ;;  %v2249_v8 = vunpack.i.h.bf16 %v2247_v24  ;;  %v1308_v31 = vmul.f32 %v3629_v5, %v1177_v38  ;;  %v2248_v6 = vunpack.i.l.bf16 %v2247_v24  ;;  %v4853_v24 = vld [vmem:[#allocation93_spill] sm:$0xff] }
 0x13c   : > { %v1300_v60 = vmul.f32 %v3629_v5, %v1169_v52  ;;  %v1463_v45 = vmul.f32 %v3632_v12, %v1169_v52  ;;  %v1626_v21 = vmul.f32 %v3635_v13, %v1169_v52  ;;  %v1333_v46 = vadd.f32 %v1301_v20, %v4845_v16  ;;  %v4854_v16 = vld [vmem:[#allocation96_spill] sm:$0xff] }
 0x13d   : > { %v1496_v32 = vadd.f32 %v1464_v50, %v4847_v47  ;;  %v1659_v40 = vadd.f32 %v1627_v4, %v4849_v49  ;;  %v1309_v7 = vmul.f32 %v3629_v5, %v1178_v39  ;;  %v4851_v50 = vld [vmem:[#allocation58_spill] sm:$0xff]  ;;  %v4852_v4 = vld [vmem:[#allocation92_spill] sm:$0xff]  ;;  %v2267_v47 = vpop.permute.xlu1 %2266  ;;  %v4856_v49 = vld [vmem:[#allocation23_spill] sm:$0xff] }
 0x13e   : > { %v1332_v48 = vadd.f32 %v1300_v60, %v4844_v33  ;;  %v1495_v17 = vadd.f32 %v1463_v45, %v4846_v36  ;;  %v1658_v63 = vadd.f32 %v1626_v21, %v4848_v54  ;;  %v1760_v51 = vadd.f32 %v1696_v58, %v1333_v46  ;;  %v4850_v58 = vld [vmem:[#allocation24_spill] sm:$0xff]  ;;  %v4855_v36 = vld [vmem:[#allocation97_spill] sm:$0xff] }
 0x13f   : > { %v1820_v52 = vadd.f32 %v4183_v35, %v1496_v32  ;;  %v1694_v1 = vadd.f32 %v3691_v10, %v1659_v40  ;;  %v951_v60 = vrot.slane %v2290_v22, 1  ;;  %v1340_v33 = vadd.f32 %v1308_v31, %v4852_v4 }
 0x140   : > { %v1759_v14 = vadd.f32 %v1695_v30, %v1332_v48  ;;  %v1819_v2 = vadd.f32 %v4180_v25, %v1495_v17  ;;  %v1693_v62 = vadd.f32 %v3691_v10, %v1658_v63  ;;  %v1824_v45 = vadd.f32 %v1760_v51, %v3933_v28 }
 0x141   : > { %v1634_v30 = vmul.f32 %v3635_v13, %v1177_v38  ;;  %v1635_v25 = vmul.f32 %v3635_v13, %v1178_v39  ;;  %v1758_v21 = vadd.f32 %v1694_v1, %v4851_v50  ;;  %1852 = vst [vmem:[%s4189_s9 + $0x48] sm:$0xff] %v1820_v52  ;;  %v1341_v48 = vadd.f32 %v1309_v7, %v4853_v24  ;;  %v4863_v24 = vld [vmem:[#allocation73_spill] sm:$0xff] }
 0x142   : > { %v1823_v20 = vadd.f32 %v1759_v14, %v3930_v9  ;;  %1851 = vst [vmem:[%s4189_s9 + $0x40] sm:$0xff] %v1819_v2  ;;  %v1757_v35 = vadd.f32 %v1693_v62, %v4850_v58  ;;  %v1471_v9 = vmul.f32 %v3632_v12, %v1177_v38  ;;  %v1472_v28 = vmul.f32 %v3632_v12, %v1178_v39 }
 0x143   : > { %v1666_v46 = vadd.f32 %v1634_v30, %v4854_v16  ;;  %v1667_v17 = vadd.f32 %v1635_v25, %v4855_v36  ;;  %v1822_v54 = vadd.f32 %v1758_v21, %v1498_v18  ;;  %1856 = vst [vmem:[%s4189_s9 + $0x68] sm:$0xff] %v1824_v45  ;;  %v980_v63 = vsel %vm966_vm1, %v951_v60, %v952_v57  ;;  %v4858_v18 = vld [vmem:[#allocation55_spill] sm:$0xff]  ;;  %v4860_v25 = vld [vmem:[#allocation69_spill] sm:$0xff]  ;;  %v4862_v21 = vld [vmem:[#allocation72_spill] sm:$0xff] }
 0x144   : > { %1855 = vst [vmem:[%s4189_s9 + $0x60] sm:$0xff] %v1823_v20  ;;  %v1821_v32 = vadd.f32 %v1757_v35, %v1497_v27  ;;  %v4857_v40 = vrot.slane %v4856_v49, 1  ;;  %v1176_v14 = vmul.f32 %v2249_v8, %v980_v63  ;;  %v2269_v51 = vunpack.i.h.bf16 %v2267_v47  ;;  %v4861_v35 = vld [vmem:[#allocation70_spill] sm:$0xff] }
 0x145   : > { %v1701_v38 = vadd.f32 %v3691_v10, %v1666_v46  ;;  %v1702_v39 = vadd.f32 %v3691_v10, %v1667_v17  ;;  %v2268_v2 = vunpack.i.l.bf16 %v2267_v47  ;;  %v958_v27 = vrot.slane %v3884_v19, 1  ;;  %1854 = vst [vmem:[%s4189_s9 + $0x58] sm:$0xff] %v1822_v54  ;;  %v4864_v46 = vld [vmem:[#allocation74_spill] sm:$0xff]  ;;  %v4865_v17 = vld [vmem:[#allocation75_spill] sm:$0xff] }
 0x146   : > { %v981_v31 = vsel %vm966_vm1, %v4857_v40, %v951_v60  ;;  %1853 = vst [vmem:[%s4189_s9 + $0x50] sm:$0xff] %v1821_v32  ;;  %v959_v52 = vrot.slane %v4858_v18, 1  ;;  %v1307_v62 = vmul.f32 %v3629_v5, %v1176_v14  ;;  %v1470_v22 = vmul.f32 %v3632_v12, %v1176_v14  ;;  %v4285_v60 = vpop.permute.xlu0 %2261 }
 0x147   : > { %v1175_v7 = vmul.f32 %v2248_v6, %v981_v31  ;;  %v1633_v6 = vmul.f32 %v3635_v13, %v1176_v14  ;;  %v4859_v20 = vrot.slane %v4793_v59, 1 }
 0x148   : > { %v973_v30 = vsel %vm966_vm1, %v958_v27, %v959_v52  ;;  %v1339_v50 = vadd.f32 %v1307_v62, %v4861_v35  ;;  %v1502_v16 = vadd.f32 %v1470_v22, %v4863_v24  ;;  %v4868_v62 = vld [vmem:[#allocation30_spill] sm:$0xff]  ;;  %v4869_v22 = vld [vmem:[#allocation99_spill] sm:$0xff] }
 0x149   : > { %v1306_v57 = vmul.f32 %v3629_v5, %v1175_v7  ;;  %v1469_v1 = vmul.f32 %v3632_v12, %v1175_v7  ;;  %v1632_v8 = vmul.f32 %v3635_v13, %v1175_v7  ;;  %v972_v45 = vsel %vm966_vm1, %v959_v52, %v4859_v20  ;;  %v4866_v52 = vld [vmem:[#allocation94_spill] sm:$0xff] }
 0x14a   : > { %v1665_v59 = vadd.f32 %v1633_v6, %v4865_v17  ;;  %v1183_v47 = vmul.f32 %v2268_v2, %v973_v30  ;;  %v1184_v32 = vmul.f32 %v2269_v51, %v972_v45  ;;  %v1766_v63 = vadd.f32 %v1702_v39, %v1339_v50  ;;  %v4867_v2 = vld [vmem:[#allocation95_spill] sm:$0xff]  ;;  %v4870_v6 = vld [vmem:[#allocation34_spill] sm:$0xff]  ;;  %v2291_v50 = vld [vmem:[%s2610_s5 + $0xb8] sm:$0xff] }
 0x14b   : > { %v1338_v58 = vadd.f32 %v1306_v57, %v4860_v25  ;;  %v1501_v4 = vadd.f32 %v1469_v1, %v4862_v21  ;;  %v1664_v36 = vadd.f32 %v1632_v8, %v4864_v46  ;;  %v1826_v40 = vadd.f32 %v4236_v61, %v1502_v16  ;;  %v4871_v17 = vld [vmem:[#allocation29_spill] sm:$0xff] }
 0x14c   : > { %v1700_v7 = vadd.f32 %v3691_v10, %v1665_v59  ;;  %v1314_v14 = vmul.f32 %v3629_v5, %v1183_v47  ;;  %v1315_v18 = vmul.f32 %v3629_v5, %v1184_v32  ;;  %v1503_v57 = vadd.f32 %v1471_v9, %v4866_v52 }
 0x14d   : > { %v1765_v54 = vadd.f32 %v1701_v38, %v1338_v58  ;;  %v1825_v49 = vadd.f32 %v4213_v37, %v1501_v4  ;;  %v1699_v31 = vadd.f32 %v3691_v10, %v1664_v36  ;;  %v1504_v51 = vadd.f32 %v1472_v28, %v4867_v2  ;;  %1858 = vst [vmem:[%s4189_s9 + $0x78] sm:$0xff] %v1826_v40 }
 0x14e   : > { %v1830_v37 = vadd.f32 %v1766_v63, %v4030_v0  ;;  %v4315_v61 = vadd.f32 %v4033_v34, %v1340_v33  ;;  %v4318_v39 = vadd.f32 %v4036_v11, %v1341_v48  ;;  %v1764_v8 = vadd.f32 %v1700_v7, %v4869_v22  ;;  %v2282_v33 = vpop.permute.xlu1 %2281  ;;  %v4335_v35 = vpop.permute.xlu0 %2276  ;;  %v4877_v22 = vld [vmem:[#allocation78_spill] sm:$0xff] }
 0x14f   : > { %v1829_v38 = vadd.f32 %v1765_v54, %v4027_v56  ;;  %1857 = vst [vmem:[%s4189_s9 + $0x70] sm:$0xff] %v1825_v49  ;;  %v1763_v1 = vadd.f32 %v1699_v31, %v4868_v62  ;;  %v1477_v9 = vmul.f32 %v3632_v12, %v1183_v47  ;;  %v1478_v56 = vmul.f32 %v3632_v12, %v1184_v32  ;;  %v2292_v49 = vld [vmem:[%s2610_s5 + $0xe8] sm:$0xff]  ;;  %v4876_v62 = vld [vmem:[#allocation77_spill] sm:$0xff] }
 0x150   : > { %v1640_v0 = vmul.f32 %v3635_v13, %v1183_v47  ;;  %v1641_v34 = vmul.f32 %v3635_v13, %v1184_v32  ;;  %v1828_v11 = vadd.f32 %v1764_v8, %v1504_v51  ;;  %1862 = vst [vmem:[%s4189_s9 + $0x98] sm:$0xff] %v1830_v37  ;;  %v1346_v48 = vadd.f32 %v1314_v14, %v3961_v23 }
 0x151   : > { %1861 = vst [vmem:[%s4189_s9 + $0x90] sm:$0xff] %v1829_v38  ;;  %v1827_v28 = vadd.f32 %v1763_v1, %v1503_v57  ;;  %v1347_v20 = vadd.f32 %v1315_v18, %v4870_v6  ;;  %v2264_v25 = vunpack.i.h.bf16 %v4285_v60  ;;  %v2263_v58 = vunpack.i.l.bf16 %v4285_v60  ;;  %v4875_v38 = vld [vmem:[#allocation76_spill] sm:$0xff] }
 0x152   : > { %v1672_v45 = vadd.f32 %v1640_v0, %v3988_v55  ;;  %v1673_v30 = vadd.f32 %v1641_v34, %v4013_v44  ;;  %v957_v21 = vrot.slane %v2291_v50, 1  ;;  %v2284_v4 = vunpack.i.h.bf16 %v2282_v33  ;;  %1860 = vst [vmem:[%s4189_s9 + $0x88] sm:$0xff] %v1828_v11  ;;  %v4879_v0 = vld [vmem:[#allocation80_spill] sm:$0xff] }
 0x153   : > { %1859 = vst [vmem:[%s4189_s9 + $0x80] sm:$0xff] %v1827_v28  ;;  %v2283_v24 = vunpack.i.l.bf16 %v2282_v33  ;;  %v964_v16 = vrot.slane %v3956_v53, 1  ;;  %v1509_v23 = vadd.f32 %v1477_v9, %v3984_v42  ;;  %v1510_v55 = vadd.f32 %v1478_v56, %v3986_v3  ;;  %v4878_v9 = vld [vmem:[#allocation79_spill] sm:$0xff]  ;;  %v4880_v33 = vld [vmem:[#allocation36_spill] sm:$0xff] }
 0x154   : > { %v1707_v44 = vadd.f32 %v3691_v10, %v1672_v45  ;;  %v965_v46 = vrot.slane %v4051_v29, 1  ;;  %v1708_v60 = vadd.f32 %v3691_v10, %v1673_v30  ;;  %v974_v36 = vsel %vm966_vm1, %v957_v21, %v958_v27  ;;  %v4873_v29 = vld [vmem:[#allocation33_spill] sm:$0xff] }
 0x155   : > { %v4872_v59 = vrot.slane %v4871_v17, 1  ;;  %v2279_v42 = vunpack.i.h.bf16 %v4335_v35  ;;  %v1182_v3 = vmul.f32 %v2264_v25, %v974_v36  ;;  %v4874_v54 = vrot.slane %v4873_v29, 1  ;;  %v4884_v36 = vld [vmem:[#allocation104_spill] sm:$0xff]  ;;  %v4885_v17 = vld [vmem:[#allocation105_spill] sm:$0xff] }
 0x156   : > { %v967_v32 = vsel %vm966_vm1, %v964_v16, %v965_v46  ;;  %v2278_v63 = vunpack.i.l.bf16 %v4335_v35  ;;  %v963_v40 = vrot.slane %v2292_v49, 1  ;;  %v2293_v35 = vld [vmem:[%s2809_s28] ss:$0 sm:$0xff]  ;;  %s1889_s28 = sshll.u32 %s4189_s9, 4  ;;  %s1890_s28 = int_to_ptr.vmem [resolvable:$true] %s1889_s28 }
 0x157   : > { %v975_v53 = vsel %vm966_vm1, %v4872_v59, %v957_v21  ;;  %v998_v10 = vsel %vm966_vm1, %v965_v46, %v4874_v54  ;;  %v4361_v19 = vmul.f32 %v2283_v24, %v967_v32  ;;  %v1313_v7 = vmul.f32 %v3629_v5, %v1182_v3  ;;  %v4886_v59 = vld [vmem:[#allocation35_spill] sm:$0xff]  ;;  %v4889_v29 = vld [vmem:[#allocation53_spill] sm:$0xff] }
 0x158   : > { %v1181_v47 = vmul.f32 %v2263_v58, %v975_v53  ;;  %v4363_v27 = vmul.f32 %v2284_v4, %v998_v10  ;;  %v1476_v18 = vmul.f32 %v3632_v12, %v1182_v3  ;;  %v1639_v57 = vmul.f32 %v3635_v13, %v1182_v3  ;;  %v4887_v53 = vld [vmem:[#allocation50_spill] sm:$0xff]  ;;  %v4888_v3 = vld [vmem:[#allocation47_spill] sm:$0xff] }
 0x159   : > { %v1320_v2 = vmul.f32 %v3629_v5, %v4361_v19  ;;  %v1345_v1 = vadd.f32 %v1313_v7, %v4876_v62  ;;  %v968_v4 = vsel %vm966_vm1, %v963_v40, %v964_v16  ;;  %v4881_v24 = vrot.slane %v4795_v26, 1 }
 0x15a   : > { %v1312_v31 = vmul.f32 %v3629_v5, %v1181_v47  ;;  %v1475_v14 = vmul.f32 %v3632_v12, %v1181_v47  ;;  %v1638_v52 = vmul.f32 %v3635_v13, %v1181_v47  ;;  %v1321_v51 = vmul.f32 %v3629_v5, %v4363_v27 }
 0x15b   : > { %v1508_v56 = vadd.f32 %v1476_v18, %v4878_v9  ;;  %v1671_v28 = vadd.f32 %v1639_v57, %v4880_v33  ;;  %v1352_v11 = vadd.f32 %v1320_v2, %v4069_v43  ;;  %v1772_v30 = vadd.f32 %v1708_v60, %v1345_v1  ;;  %v4890_v18 = vld [vmem:[#allocation90_spill] sm:$0xff]  ;;  %v4897_v33 = vld [vmem:[#allocation48_spill] sm:$0xff] }
 0x15c   : > { %v1344_v37 = vadd.f32 %v1312_v31, %v4875_v38  ;;  %v1507_v8 = vadd.f32 %v1475_v14, %v4877_v22  ;;  %v1670_v34 = vadd.f32 %v1638_v52, %v4879_v0  ;;  %v1353_v6 = vadd.f32 %v1321_v51, %v4081_v41  ;;  %v4882_v41 = vld [vmem:[#allocation102_spill] sm:$0xff] }
 0x15d   : > { %v1832_v58 = vadd.f32 %v4318_v39, %v1508_v56  ;;  %v1706_v21 = vadd.f32 %v2293_v35, %v1671_v28  ;;  %v969_v43 = vsel %vm966_vm1, %v4881_v24, %v963_v40  ;;  %v1646_v39 = vmul.f32 %v3635_v13, %v4361_v19  ;;  %v4891_v57 = vld [vmem:[#allocation22_spill] sm:$0xff]  ;;  %v4895_v56 = vld [vmem:[#allocation44_spill] sm:$0xff] }
 0x15e   : > { %v1771_v45 = vadd.f32 %v1707_v44, %v1344_v37  ;;  %v1831_v25 = vadd.f32 %v4315_v61, %v1507_v8  ;;  %v1705_v50 = vadd.f32 %v2293_v35, %v1670_v34  ;;  %v4883_v61 = vld [vmem:[#allocation103_spill] sm:$0xff]  ;;  %v1647_v60 = vmul.f32 %v3635_v13, %v4363_v27  ;;  %v4902_v24 = vld [vmem:[#allocation16_spill] sm:$0xff] }
 0x15f   : > { %v1836_v46 = vadd.f32 %v1772_v30, %v4883_v61  ;;  %v1773_v16 = vadd.f32 %v4884_v36, %v1346_v48  ;;  %v1774_v26 = vadd.f32 %v4885_v17, %v1347_v20  ;;  %v1770_v47 = vadd.f32 %v1706_v21, %v4887_v53  ;;  %1864 = vst [vmem:[%s4189_s9 + $0xa8] sm:$0xff] %v1832_v58  ;;  %v4894_v8 = vld [vmem:[#allocation43_spill] sm:$0xff] }
 0x160   : > { %v1835_v44 = vadd.f32 %v1771_v45, %v4882_v41  ;;  %1863 = vst [vmem:[%s4189_s9 + $0xa0] sm:$0xff] %v1831_v25  ;;  %v1769_v15 = vadd.f32 %v1705_v50, %v4886_v59  ;;  %v1678_v32 = vadd.f32 %v1646_v39, %v4888_v3  ;;  %v1679_v54 = vadd.f32 %v1647_v60, %v4889_v29  ;;  %v4898_v45 = vld [vmem:[#allocation49_spill] sm:$0xff]  ;;  %v4906_v60 = vld [vmem:[#allocation100_spill] sm:$0xff] }
 0x161   : > { %v1715_v10 = vmul.f32 0.0, %v1352_v11  ;;  %v1716_v49 = vmul.f32 0.0, %v1353_v6  ;;  %v1834_v40 = vadd.f32 %v1770_v47, %v1510_v55  ;;  %1868 = vst [vmem:[%s4189_s9 + $0xc8] sm:$0xff] %v1836_v46  ;;  %v1187_v20 = vmul.f32 %v2278_v63, %v969_v43  ;;  %v4892_v55 = vld [vmem:[#allocation18_spill] sm:$0xff]  ;;  %v4893_v63 = vld [vmem:[#allocation19_spill] sm:$0xff]  ;;  %v4904_v43 = vld [vmem:[#allocation101_spill] sm:$0xff] }
 0x162   : > { %1867 = vst [vmem:[%s4189_s9 + $0xc0] sm:$0xff] %v1835_v44  ;;  %v1833_v48 = vadd.f32 %v1769_v15, %v1509_v23  ;;  %v1188_v31 = vmul.f32 %v2279_v42, %v968_v4  ;;  %v1713_v7 = vadd.f32 %v2293_v35, %v1678_v32  ;;  %v1714_v14 = vadd.f32 %v2293_v35, %v1679_v54  ;;  %v4901_v4 = vld [vmem:[#allocation26_spill] sm:$0xff]  ;;  %v4905_v46 = vld [vmem:[#allocation21_spill] sm:$0xff] }
 0x163   : > { %v1747_v52 = vadd.f32 %v1715_v10, %v4890_v18  ;;  %v1748_v2 = vadd.f32 %v1716_v49, %v4891_v57  ;;  %v1318_v51 = vmul.f32 %v3629_v5, %v1187_v20  ;;  %v1481_v37 = vmul.f32 %v3632_v12, %v1187_v20  ;;  %1866 = vst [vmem:[%s4189_s9 + $0xb8] sm:$0xff] %v1834_v40 }
 0x164   : > { %1865 = vst [vmem:[%s4189_s9 + $0xb0] sm:$0xff] %v1833_v48  ;;  %v1319_v38 = vmul.f32 %v3629_v5, %v1188_v31  ;;  %v1482_v23 = vmul.f32 %v3632_v12, %v1188_v31  ;;  %v1644_v1 = vmul.f32 %v3635_v13, %v1187_v20  ;;  %v1645_v22 = vmul.f32 %v3635_v13, %v1188_v31  ;;  %v4896_v5 = vld [vmem:[#allocation45_spill] sm:$0xff]  ;;  %v4899_v13 = vld [vmem:[#allocation52_spill] sm:$0xff] }
 0x165   : > { %v1811_v42 = vadd.f32 %v1747_v52, %v4892_v55  ;;  %v1812_v62 = vadd.f32 %v1748_v2, %v4893_v63  ;;  %v1350_v9 = vadd.f32 %v1318_v51, %v4894_v8  ;;  %v1513_v34 = vadd.f32 %v1481_v37, %v4896_v5 }
 0x166   : > { %v1351_v0 = vadd.f32 %v1319_v38, %v4895_v56  ;;  %v1514_v28 = vadd.f32 %v1482_v23, %v4897_v33  ;;  %v1483_v11 = vmul.f32 %v3632_v12, %v4361_v19  ;;  %v1484_v6 = vmul.f32 %v3632_v12, %v4363_v27  ;;  %v4903_v27 = vld [vmem:[#allocation98_spill] sm:$0xff] }
 0x167   : > { %1843 = vst [vmem:[%s4189_s9] sm:$0xff] %v1811_v42  ;;  %v1676_v30 = vadd.f32 %v1644_v1, %v4898_v45  ;;  %v1677_v25 = vadd.f32 %v1645_v22, %v4899_v13  ;;  %v1777_v58 = vadd.f32 %v1713_v7, %v1350_v9  ;;  %v1837_v21 = vadd.f32 %v1773_v16, %v1513_v34  ;;  %v4907_v16 = vld [vmem:[#allocation57_spill] sm:$0xff] }
 0x168   : > { %1844 = vst [vmem:[%s4189_s9 + $0x8] sm:$0xff] %v1812_v62  ;;  %v1778_v50 = vadd.f32 %v1714_v14, %v1351_v0  ;;  %v1838_v19 = vadd.f32 %v1774_v26, %v1514_v28  ;;  %v1348_v12 = vadd.f32 %v4902_v24, %v4901_v4  ;;  %v1349_v41 = vadd.f32 %v4904_v43, %v4903_v27  ;;  %v4908_v26 = vld [vmem:[#allocation46_spill] sm:$0xff] }
 0x169   : > { %v1711_v44 = vadd.f32 %v2293_v35, %v1676_v30  ;;  %v1712_v61 = vadd.f32 %v2293_v35, %v1677_v25  ;;  %v1841_v39 = vadd.f32 %v4905_v46, %v1777_v58  ;;  %1869 = vst [vmem:[%s4189_s9 + $0xd0] sm:$0xff] %v1837_v21  ;;  %v1515_v17 = vadd.f32 %v1483_v11, %v4907_v16 }
 0x16a   : > { %v1842_v36 = vadd.f32 %v4906_v60, %v1778_v50  ;;  %v1516_v59 = vadd.f32 %v1484_v6, %v4908_v26  ;;  %1870 = vst [vmem:[%s4189_s9 + $0xd8] sm:$0xff] %v1838_v19 }
 0x16b   : > { %v1775_v15 = vadd.f32 %v1711_v44, %v1348_v12  ;;  %v1776_v53 = vadd.f32 %v1712_v61, %v1349_v41  ;;  %1873 = vst [vmem:[%s4189_s9 + $0xf0] sm:$0xff] %v1841_v39 }
 0x16c   : > { %1874 = vst [vmem:[%s4189_s9 + $0xf8] sm:$0xff] %v1842_v36 }
 0x16d   : > { %v1839_v35 = vadd.f32 %v1775_v15, %v1515_v17  ;;  %v1840_v47 = vadd.f32 %v1776_v53, %v1516_v59 }
 0x16f   : > { %1871 = vst [vmem:[%s4189_s9 + $0xe0] sm:$0xff] %v1839_v35 }
 0x170   : > { %1872 = vst [vmem:[%s4189_s9 + $0xe8] sm:$0xff] %v1840_v47 }
 0x171   : > { %2349 = shalt.err (!%p2346_p0)
}
 0x172   : > { %s2443_s4 = smov 128   ;;  %s2444_s15 = smov 384  }
 0x173   : > { %s2445_s9 = smov 8  }
 0x174   : > { %2027 = dma.vmem_to_hbm [thread:$0]  (%p2574_p13), %s1890_s28, 4096, %s1892_s10, %s1876_s13, %s2443_s4, %s2444_s15, %s2445_s9  }
 0x175 PF: > { %s4910_s17 = sld [smem:[#allocation9_spill]]  ;;  %p2033_p2 = scmp.ge.s32.totalorder %s2436_s24, 2 }
 0x177   : > { %p2030_p1 = pnand %p2033_p2, %p2581_p4 }
 0x179   : > { %p2031_p3 = pneg %p2030_p1 }
 0x17b   : > { %s1906_s20 = sand.u32 1, %s4910_s17  }
 0x17c   : > { %s1907_s5 = scalar_lea.sflag [#allocation4], %s1906_s20 }
 0x17d   : > { %2395 = dma.done.wait (%p2031_p3), %s1907_s5, 4096  }
 0x17e   : > { %2397 = vsyncadd (%p2031_p3), %s1907_s5, 4294963200  ;;  %s20_s24 = sadd.s32 1, %s2436_s24   ;;  %s4912_s27 = sld [smem:[#allocation12_spill]] }
 0x17f   : > { %p17_p5 = scmp.ge.s32.totalorder %s20_s24, 8   ;;  %s4913_s12 = sld [smem:[#allocation13_spill]] }
 0x180   : > { %s4914_s28 = sld [smem:[#allocation10_spill]]  ;;  %s4916_s15 = smov %s2404_s16 }
 0x181   : > { %s4915_s10 = sld [smem:[#allocation11_spill]]  ;;  %s4918_s17 = smov %s2412_s18 }
 0x182   : > { %s4919_s18 = smov %s2416_s19  ;;  %s4921_s20 = smov %s2428_s22 }
 0x183   : > { %s4922_s21 = smov %s2432_s23  ;;  %19 = sbr.rel (!%p17_p5) target bundleno = 10 (0xa), region = 133 }
 0x184   : > { %s4917_s16 = smov %s4912_s27 }
 0x185   : > { %s4920_s19 = smov %s4913_s12 }
 0x186   : > { %s4923_s22 = smov %s4914_s28 }
 0x187   : > { %s4924_s23 = smov %s4915_s10 }
 0x188   :  { %1913 = vsyncpa [#allocation3], 1 }
 0x189   :  { %1915 = vsyncpa [#allocation3 + $0x1], 1 }
 0x18a   :  { %1916 = vsyncpa [#allocation4], 1 }
 0x18b   :  { %1918 = vsyncpa [#allocation4 + $0x1], 1 }

</bundles_post_ra>
